<compile_context>
chip_gen: v5e
topology: v5e:2x2
jax: 0.10.0
libtpu: 0.0.40
codegen_flags: <defaults>
</compile_context>

<pallas_src>
import functools
from typing import NamedTuple, Optional, Tuple

import jax
import jax.numpy as jnp
import numpy as np
from jax.experimental import pallas as pl


class Meta(NamedTuple):
    num_layers: int
    hidden: int
    f_out: int
    wi_offs: Tuple[int, ...]
    wh_offs: Tuple[int, ...]
    bias_offs: Tuple[int, ...]
    head_off: int


# ---------------------------------------------------------------------------
# Kernels
# ---------------------------------------------------------------------------
def _tfnaive_wavefront_kernel(x_ref, blob_ref, wbd_ref, o_ref, *,
                              T, B, H, F_in, F_out,
                              wi_off, bias_offs, head_off):
    """Fused 2-layer GRU + Linear head, layer-wavefront schedule."""
    H2, H3 = 2 * H, 3 * H

    # ---- unpack parameters (static slices of the packed blob) -------------
    wi1 = blob_ref[wi_off:wi_off + F_in, :][:, :H3]               # (F_in, 3H)
    b1 = blob_ref[bias_offs[0]:bias_offs[0] + 2, :]
    bi1, bhn1 = b1[0:1, :H3], b1[1:2, :H]
    b2 = blob_ref[bias_offs[1]:bias_offs[1] + 2, :]
    bi2, bhn2 = b2[0:1, :H3], b2[1:2, :H]
    head = blob_ref[head_off:head_off + H + 1, :]
    w_out, b_out = head[:H, :F_out], head[H:H + 1, :F_out]
    wbd = wbd_ref[...]                                             # (2H, 6H)

    x = x_ref[...]                                                 # (T*B, F_in)

    # ---- hoisted layer-1 input projection: one matmul, off the recurrence -
    xproj1 = jnp.dot(x, wi1, preferred_element_type=jnp.float32) + bi1

    bhn1_b = jnp.broadcast_to(bhn1, (B, H))
    bhn_stack = jnp.concatenate(
        [bhn1_b, jnp.broadcast_to(bhn2, (B, H))], axis=0)          # (2B, H)

    # masks selecting layer-1 / layer-2 rows of the stacked state (built once)
    rows = jax.lax.broadcasted_iota(jnp.int32, (2 * B, H), 0)
    top = (rows < B).astype(jnp.float32)
    bot = 1.0 - top

    # ---- wave step 0: layer-1 t=0 only; h1 == 0 so no recurrent matmul ----
    xp0 = xproj1[0:B, :]
    rz = jax.nn.sigmoid(xp0[:, :H2])
    r, z = rz[:, :H], rz[:, H:]
    n = jnp.tanh(xp0[:, H2:] + r * bhn1_b)
    h1 = (1.0 - z) * n
    h_stack = jnp.concatenate([h1, jnp.zeros((B, H), jnp.float32)], axis=0)

    # ---- wave steps 1..T: ONE fused (2B,2H)@(2H,6H) matmul per step --------
    for s in range(1, T + 1):
        lhs = jnp.concatenate([h_stack * top, h_stack * bot], axis=1)  # (2B,2H)
        g = jnp.dot(lhs, wbd, preferred_element_type=jnp.float32)      # (2B,6H)
        gh = g[:, :H3]                           # rows 0:B -> gh1, B:2B -> gh2
        xp2 = g[0:B, H3:] + bi2                  # layer-2 input proj (t = s-1)
        if s < T:
            xp_top = xproj1[s * B:(s + 1) * B, :]
        else:                                    # layer-1 idle on last wave;
            xp_top = jnp.zeros((B, H3), jnp.float32)   # its rows become unused
        xp = jnp.concatenate([xp_top, xp2], axis=0)    # (2B, 3H)
        rz = jax.nn.sigmoid(xp[:, :H2] + gh[:, :H2])   # both layers, one push
        r, z = rz[:, :H], rz[:, H:]
        n = jnp.tanh(xp[:, H2:] + r * (gh[:, H2:] + bhn_stack))
        h_stack = n + z * (h_stack - n)

    h2 = h_stack[B:, :]                           # layer-2 hidden at t = T-1
    o_ref[...] = jnp.dot(h2, w_out, preferred_element_type=jnp.float32) + b_out


def _tfnaive_generic_kernel(x_ref, blob_ref, o_ref, *,
                            num_layers, T, B, H, F_in, F_out,
                            wi_offs, wh_offs, bias_offs, head_off):
    """Fused L-layer GRU + Linear head (sequential layer schedule)."""
    H2, H3 = 2 * H, 3 * H
    seq = x_ref[...]                              # current layer input (vregs)
    f_in = F_in
    h = None
    for layer in range(num_layers):
        wi = blob_ref[wi_offs[layer]:wi_offs[layer] + f_in, :][:, :H3]
        wh = blob_ref[wh_offs[layer]:wh_offs[layer] + H, :][:, :H3]
        b = blob_ref[bias_offs[layer]:bias_offs[layer] + 2, :]
        bi, bhn = b[0:1, :H3], b[1:2, :H]
        bhn_b = jnp.broadcast_to(bhn, (B, H))

        # hoisted input projection: one matmul for the whole sequence
        xproj = jnp.dot(seq, wi, preferred_element_type=jnp.float32) + bi

        # t = 0: h == 0 -> skip the recurrent matmul
        xp = xproj[0:B, :]
        rz = jax.nn.sigmoid(xp[:, :H2])
        r, z = rz[:, :H], rz[:, H:]
        n = jnp.tanh(xp[:, H2:] + r * bhn_b)
        h = (1.0 - z) * n
        hs = [h]
        for t in range(1, T):
            gh = jnp.dot(h, wh, preferred_element_type=jnp.float32)
            xp = xproj[t * B:(t + 1) * B, :]
            rz = jax.nn.sigmoid(xp[:, :H2] + gh[:, :H2])
            r, z = rz[:, :H], rz[:, H:]
            n = jnp.tanh(xp[:, H2:] + r * (gh[:, H2:] + bhn_b))
            h = n + z * (h - n)
            hs.append(h)
        if layer < num_layers - 1:
            seq = jnp.concatenate(hs, axis=0)     # (T*B, H), stays in vregs
            f_in = H

    head = blob_ref[head_off:head_off + H + 1, :]
    w_out, b_out = head[:H, :F_out], head[H:H + 1, :F_out]
    o_ref[...] = jnp.dot(h, w_out, preferred_element_type=jnp.float32) + b_out


# ---------------------------------------------------------------------------
# Wrapper
# ---------------------------------------------------------------------------
def tfnaive_forward(X, blob, wbd=None, *, meta):
    """TFnaive.forward(X, return_intermediary=False): (B, F, T) -> (B, F)."""
    assert X.ndim == 3
    B, F_in, T = X.shape
    H, L, F_out = meta.hidden, meta.num_layers, meta.f_out

    # (B, F, T) -> (B, T, F) [torch.transpose(X,1,2)] -> time-major rows t*B+b
    x2d = jnp.transpose(X, (2, 0, 1)).reshape(T * B, F_in).astype(jnp.float32)

    def full_spec(a):                             # whole array resident in VMEM
        return pl.BlockSpec(a.shape, lambda *_: (0,) * a.ndim)

    if L == 2 and wbd is not None:
        kernel = functools.partial(
            _tfnaive_wavefront_kernel, T=T, B=B, H=H, F_in=F_in, F_out=F_out,
            wi_off=meta.wi_offs[0], bias_offs=meta.bias_offs,
            head_off=meta.head_off)
        inputs = (x2d, blob, wbd)
    else:
        kernel = functools.partial(
            _tfnaive_generic_kernel, num_layers=L, T=T, B=B, H=H,
            F_in=F_in, F_out=F_out, wi_offs=meta.wi_offs,
            wh_offs=meta.wh_offs, bias_offs=meta.bias_offs,
            head_off=meta.head_off)
        inputs = (x2d, blob)

    return pl.pallas_call(
        kernel,
        out_shape=jax.ShapeDtypeStruct((B, F_out), jnp.float32),
        in_specs=[full_spec(a) for a in inputs],
        out_specs=pl.BlockSpec((B, F_out), lambda *_: (0, 0)),
    )(*inputs)


# ---------------------------------------------------------------------------
# Parameters: PyTorch-layout init + host-side fold & pack
# ---------------------------------------------------------------------------
def init_params(key, input_size, hidden_size, num_layers):
    """PyTorch-layout parameters, U(-1/sqrt(H), 1/sqrt(H)) like nn.GRU."""
    H = hidden_size
    bound = 1.0 / np.sqrt(H)

    def u(k, shape):
        return jax.random.uniform(k, shape, jnp.float32, -bound, bound)

    params = {"gru_layers": []}
    for layer in range(num_layers):
        f_in = input_size if layer == 0 else H
        key, k0, k1, k2, k3 = jax.random.split(key, 5)
        params["gru_layers"].append({
            "w_ih": u(k0, (3 * H, f_in)),   # gate order r | z | n (PyTorch)
            "w_hh": u(k1, (3 * H, H)),
            "b_ih": u(k2, (3 * H,)),
            "b_hh": u(k3, (3 * H,)),
        })
    key, k1, k2 = jax.random.split(key, 3)
    params["w_out"] = u(k1, (input_size, H))    # Linear: (out, in)
    params["b_out"] = u(k2, (input_size,))
    return params


def pack_params(params, input_size):
    """Fold biases & pack all weights into one lane-aligned blob (host-side)."""
    layers = params["gru_layers"]
    L = len(layers)
    H = layers[0]["w_hh"].shape[1]
    H3 = 3 * H
    F_out = params["w_out"].shape[0]
    width = max(128, -(-H3 // 128) * 128)

    def pad8(n):
        return -(-n // 8) * 8

    segs, row = [], 0

    def add_seg(nrows):
        nonlocal row
        a = np.zeros((pad8(nrows), width), np.float32)
        segs.append(a)
        off = row
        row += a.shape[0]
        return off, a

    wi_offs, wh_offs, bias_offs = [], [], []
    for l, lp in enumerate(layers):
        f_in = input_size if l == 0 else H
        w_ih = np.asarray(lp["w_ih"], np.float32)
        w_hh = np.asarray(lp["w_hh"], np.float32)
        b_ih = np.asarray(lp["b_ih"], np.float32)
        b_hh = np.asarray(lp["b_hh"], np.float32)

        off, a = add_seg(f_in)
        a[:f_in, :H3] = w_ih.T
        wi_offs.append(off)

        off, a = add_seg(H)
        a[:H, :H3] = w_hh.T
        wh_offs.append(off)

        off, a = add_seg(2)
        bi = b_ih.copy()
        bi[:2 * H] += b_hh[:2 * H]           # fold b_hr, b_hz into input bias
        a[0, :H3] = bi
        a[1, :H] = b_hh[2 * H:]              # b_hn kept (r-gated in kernel)
        bias_offs.append(off)

    off, a = add_seg(H + 1)
    a[:H, :F_out] = np.asarray(params["w_out"], np.float32).T
    a[H, :F_out] = np.asarray(params["b_out"], np.float32)
    head_off = off

    blob = jnp.asarray(np.concatenate(segs, axis=0))

    wbd = None
    if L == 2:
        # Block-stacked recurrent matrix for the wavefront schedule:
        #   [[Wh1 | Wi2],
        #    [Wh2 |  0 ]]   shape (2H, 6H), all pre-transposed to (in, out).
        wbd_np = np.zeros((2 * H, 2 * H3), np.float32)
        wbd_np[:H, :H3] = np.asarray(layers[0]["w_hh"], np.float32).T
        wbd_np[:H, H3:] = np.asarray(layers[1]["w_ih"], np.float32).T
        wbd_np[H:, :H3] = np.asarray(layers[1]["w_hh"], np.float32).T
        wbd = jnp.asarray(wbd_np)

    meta = Meta(num_layers=L, hidden=H, f_out=F_out,
                wi_offs=tuple(wi_offs), wh_offs=tuple(wh_offs),
                bias_offs=tuple(bias_offs), head_off=head_off)
    return blob, wbd, meta


# ---------------------------------------------------------------------------
# Pure-JAX reference (correctness check only; uses the raw PyTorch layout)
# ---------------------------------------------------------------------------
def tfnaive_reference(X, params):
    x = jnp.transpose(X, (2, 0, 1)).astype(jnp.float32)     # (T, B, F)
    for lp in params["gru_layers"]:
        w_ih, w_hh, b_ih, b_hh = lp["w_ih"], lp["w_hh"], lp["b_ih"], lp["b_hh"]
        H = w_hh.shape[1]
        B = x.shape[1]

        def step(h, x_t, w_ih=w_ih, w_hh=w_hh, b_ih=b_ih, b_hh=b_hh, H=H):
            gi = x_t @ w_ih.T + b_ih
            gg = h @ w_hh.T + b_hh
            r = jax.nn.sigmoid(gi[:, :H] + gg[:, :H])
            z = jax.nn.sigmoid(gi[:, H:2 * H] + gg[:, H:2 * H])
            n = jnp.tanh(gi[:, 2 * H:] + r * gg[:, 2 * H:])
            h_new = (1.0 - z) * n + z * h
            return h_new, h_new

        _, x = jax.lax.scan(step, jnp.zeros((B, H), jnp.float32), x)
    return x[-1] @ params["w_out"].T + params["b_out"]


# ---------------------------------------------------------------------------
if __name__ == "__main__":
    input_size, hidden_size, num_layers = 4, 32, 2
    batch, seq_len = 2, 8

    key = jax.random.PRNGKey(0)
    key, kx = jax.random.split(key)
    # PyTorch forward expects (B, input_size, seq_len)
    X = jax.random.normal(kx, (batch, input_size, seq_len), jnp.float32)

    params = init_params(key, input_size, hidden_size, num_layers)
    blob, wbd, meta = pack_params(params, input_size)

    fwd = jax.jit(functools.partial(tfnaive_forward, meta=meta))
    out = jax.block_until_ready(fwd(X, blob, wbd))

    ref = jax.block_until_ready(tfnaive_reference(X, params))
    np.testing.assert_allclose(np.asarray(out), np.asarray(ref),
                               rtol=1e-4, atol=1e-4)
    assert out.shape == (batch, input_size)

    # Also exercise the generic (non-wavefront) path with 3 layers.
    params3 = init_params(jax.random.PRNGKey(1), input_size, hidden_size, 3)
    blob3, wbd3, meta3 = pack_params(params3, input_size)
    fwd3 = jax.jit(functools.partial(tfnaive_forward, meta=meta3))
    out3 = jax.block_until_ready(fwd3(X, blob3, wbd3))
    ref3 = jax.block_until_ready(tfnaive_reference(X, params3))
    np.testing.assert_allclose(np.asarray(out3), np.asarray(ref3),
                               rtol=1e-4, atol=1e-4)

    print("KERNEL_OK")
</pallas_src>

<mosaic_0001>
module attributes {stable_mosaic.version = 11 : i64} {
  func.func @_tfnaive_wavefront_kernel(%arg0: memref<16x4xf32, #tpu.memory_space<vmem>>, %arg1: memref<160x128xf32, #tpu.memory_space<vmem>>, %arg2: memref<64x192xf32, #tpu.memory_space<vmem>>, %arg3: memref<2x4xf32, #tpu.memory_space<vmem>>) attributes {dimension_semantics = [], scalar_prefetch = 0 : i64, scratch_operands = 0 : i64, tpu.core_type = #tpu.core_type<tc>} {
    %c0 = arith.constant 0 : index
    %c0_0 = arith.constant 0 : index
    %0 = vector.load %arg1[%c0, %c0_0] : memref<160x128xf32, #tpu.memory_space<vmem>>, vector<4x128xf32>
    %1 = vector.extract_strided_slice %0 {offsets = [0, 0], sizes = [4, 96], strides = [1, 1]} : vector<4x128xf32> to vector<4x96xf32>
    %c40 = arith.constant 40 : index
    %c0_1 = arith.constant 0 : index
    %2 = vector.load %arg1[%c40, %c0_1] : memref<160x128xf32, #tpu.memory_space<vmem>>, vector<2x128xf32>
    %3 = vector.extract_strided_slice %2 {offsets = [0, 0], sizes = [1, 96], strides = [1, 1]} : vector<2x128xf32> to vector<1x96xf32>
    %4 = vector.extract_strided_slice %2 {offsets = [1, 0], sizes = [1, 32], strides = [1, 1]} : vector<2x128xf32> to vector<1x32xf32>
    %c112 = arith.constant 112 : index
    %c0_2 = arith.constant 0 : index
    %5 = vector.load %arg1[%c112, %c0_2] : memref<160x128xf32, #tpu.memory_space<vmem>>, vector<2x128xf32>
    %6 = vector.extract_strided_slice %5 {offsets = [0, 0], sizes = [1, 96], strides = [1, 1]} : vector<2x128xf32> to vector<1x96xf32>
    %7 = vector.extract_strided_slice %5 {offsets = [1, 0], sizes = [1, 32], strides = [1, 1]} : vector<2x128xf32> to vector<1x32xf32>
    %c120 = arith.constant 120 : index
    %c0_3 = arith.constant 0 : index
    %8 = vector.load %arg1[%c120, %c0_3] : memref<160x128xf32, #tpu.memory_space<vmem>>, vector<33x128xf32>
    %9 = vector.extract_strided_slice %8 {offsets = [0, 0], sizes = [32, 4], strides = [1, 1]} : vector<33x128xf32> to vector<32x4xf32>
    %10 = vector.extract_strided_slice %8 {offsets = [32, 0], sizes = [1, 4], strides = [1, 1]} : vector<33x128xf32> to vector<1x4xf32>
    %c0_4 = arith.constant 0 : index
    %c0_5 = arith.constant 0 : index
    %11 = vector.load %arg2[%c0_4, %c0_5] : memref<64x192xf32, #tpu.memory_space<vmem>>, vector<64x192xf32>
    %c0_6 = arith.constant 0 : index
    %c0_7 = arith.constant 0 : index
    %12 = vector.load %arg0[%c0_6, %c0_7] : memref<16x4xf32, #tpu.memory_space<vmem>>, vector<16x4xf32>
    %cst = arith.constant dense<0.000000e+00> : vector<16x96xf32>
    %13 = tpu.matmul %12, %1, %cst {dimension_numbers = #tpu.dot_dimension_numbers<[1], [0], [0], [1], [0, 0, 1, 1], [], []>} : vector<16x4xf32>, vector<4x96xf32>, vector<16x96xf32> -> vector<16x96xf32>
    %14 = vector.broadcast %3 : vector<1x96xf32> to vector<16x96xf32>
    %15 = arith.addf %13, %14 : vector<16x96xf32>
    %16 = vector.shape_cast %4 : vector<1x32xf32> to vector<1x32xf32>
    %17 = vector.broadcast %16 : vector<1x32xf32> to vector<2x32xf32>
    %18 = vector.shape_cast %7 : vector<1x32xf32> to vector<1x32xf32>
    %19 = vector.broadcast %18 : vector<1x32xf32> to vector<2x32xf32>
    %20 = tpu.concatenate %17, %19 in 0 : vector<2x32xf32>, vector<2x32xf32> -> vector<4x32xf32>
    %21 = tpu.iota {dimensions = array<i32: 0>} : vector<4x32xi32>
    %c2_i32 = arith.constant 2 : i32
    %22 = vector.broadcast %c2_i32 : i32 to vector<4x32xi32>
    %23 = arith.cmpi slt, %21, %22 : vector<4x32xi32>
    %24 = arith.extui %23 : vector<4x32xi1> to vector<4x32xi32>
    %25 = arith.sitofp %24 : vector<4x32xi32> to vector<4x32xf32>
    %cst_8 = arith.constant 1.000000e+00 : f32
    %26 = vector.broadcast %cst_8 : f32 to vector<4x32xf32>
    %27 = arith.subf %26, %25 : vector<4x32xf32>
    %28 = vector.extract_strided_slice %15 {offsets = [0, 0], sizes = [2, 96], strides = [1, 1]} : vector<16x96xf32> to vector<2x96xf32>
    %29 = vector.extract_strided_slice %28 {offsets = [0, 0], sizes = [2, 64], strides = [1, 1]} : vector<2x96xf32> to vector<2x64xf32>
    %30 = arith.negf %29 : vector<2x64xf32>
    %31 = math.exp %30 : vector<2x64xf32>
    %cst_9 = arith.constant 1.000000e+00 : f32
    %32 = vector.broadcast %cst_9 : f32 to vector<2x64xf32>
    %33 = arith.addf %32, %31 : vector<2x64xf32>
    %34 = arith.divf %32, %33 : vector<2x64xf32>
    %35 = vector.extract_strided_slice %34 {offsets = [0, 0], sizes = [2, 32], strides = [1, 1]} : vector<2x64xf32> to vector<2x32xf32>
    %36 = vector.extract_strided_slice %34 {offsets = [0, 32], sizes = [2, 32], strides = [1, 1]} : vector<2x64xf32> to vector<2x32xf32>
    %37 = vector.extract_strided_slice %28 {offsets = [0, 64], sizes = [2, 32], strides = [1, 1]} : vector<2x96xf32> to vector<2x32xf32>
    %38 = arith.mulf %35, %17 : vector<2x32xf32>
    %39 = arith.addf %37, %38 : vector<2x32xf32>
    %40 = math.tanh %39 : vector<2x32xf32>
    %cst_10 = arith.constant 1.000000e+00 : f32
    %41 = vector.broadcast %cst_10 : f32 to vector<2x32xf32>
    %42 = arith.subf %41, %36 : vector<2x32xf32>
    %43 = arith.mulf %42, %40 : vector<2x32xf32>
    %cst_11 = arith.constant 0.000000e+00 : f32
    %44 = vector.broadcast %cst_11 : f32 to vector<2x32xf32>
    %45 = tpu.concatenate %43, %44 in 0 : vector<2x32xf32>, vector<2x32xf32> -> vector<4x32xf32>
    %46 = arith.mulf %45, %25 : vector<4x32xf32>
    %47 = arith.mulf %45, %27 : vector<4x32xf32>
    %48 = tpu.concatenate %46, %47 in 1 : vector<4x32xf32>, vector<4x32xf32> -> vector<4x64xf32>
    %cst_12 = arith.constant dense<0.000000e+00> : vector<4x192xf32>
    %49 = tpu.matmul %48, %11, %cst_12 {dimension_numbers = #tpu.dot_dimension_numbers<[1], [0], [0], [1], [0, 0, 1, 1], [], []>} : vector<4x64xf32>, vector<64x192xf32>, vector<4x192xf32> -> vector<4x192xf32>
    %50 = vector.extract_strided_slice %49 {offsets = [0, 0], sizes = [4, 96], strides = [1, 1]} : vector<4x192xf32> to vector<4x96xf32>
    %51 = vector.extract_strided_slice %49 {offsets = [0, 96], sizes = [2, 96], strides = [1, 1]} : vector<4x192xf32> to vector<2x96xf32>
    %52 = vector.broadcast %6 : vector<1x96xf32> to vector<2x96xf32>
    %53 = arith.addf %51, %52 : vector<2x96xf32>
    %54 = vector.extract_strided_slice %15 {offsets = [2, 0], sizes = [2, 96], strides = [1, 1]} : vector<16x96xf32> to vector<2x96xf32>
    %55 = tpu.concatenate %54, %53 in 0 : vector<2x96xf32>, vector<2x96xf32> -> vector<4x96xf32>
    %56 = vector.extract_strided_slice %55 {offsets = [0, 0], sizes = [4, 64], strides = [1, 1]} : vector<4x96xf32> to vector<4x64xf32>
    %57 = vector.extract_strided_slice %50 {offsets = [0, 0], sizes = [4, 64], strides = [1, 1]} : vector<4x96xf32> to vector<4x64xf32>
    %58 = arith.addf %56, %57 : vector<4x64xf32>
    %59 = arith.negf %58 : vector<4x64xf32>
    %60 = math.exp %59 : vector<4x64xf32>
    %cst_13 = arith.constant 1.000000e+00 : f32
    %61 = vector.broadcast %cst_13 : f32 to vector<4x64xf32>
    %62 = arith.addf %61, %60 : vector<4x64xf32>
    %63 = arith.divf %61, %62 : vector<4x64xf32>
    %64 = vector.extract_strided_slice %63 {offsets = [0, 0], sizes = [4, 32], strides = [1, 1]} : vector<4x64xf32> to vector<4x32xf32>
    %65 = vector.extract_strided_slice %63 {offsets = [0, 32], sizes = [4, 32], strides = [1, 1]} : vector<4x64xf32> to vector<4x32xf32>
    %66 = vector.extract_strided_slice %55 {offsets = [0, 64], sizes = [4, 32], strides = [1, 1]} : vector<4x96xf32> to vector<4x32xf32>
    %67 = vector.extract_strided_slice %50 {offsets = [0, 64], sizes = [4, 32], strides = [1, 1]} : vector<4x96xf32> to vector<4x32xf32>
    %68 = arith.addf %67, %20 : vector<4x32xf32>
    %69 = arith.mulf %64, %68 : vector<4x32xf32>
    %70 = arith.addf %66, %69 : vector<4x32xf32>
    %71 = math.tanh %70 : vector<4x32xf32>
    %72 = arith.subf %45, %71 : vector<4x32xf32>
    %73 = arith.mulf %65, %72 : vector<4x32xf32>
    %74 = arith.addf %71, %73 : vector<4x32xf32>
    %75 = arith.mulf %74, %25 : vector<4x32xf32>
    %76 = arith.mulf %74, %27 : vector<4x32xf32>
    %77 = tpu.concatenate %75, %76 in 1 : vector<4x32xf32>, vector<4x32xf32> -> vector<4x64xf32>
    %cst_14 = arith.constant dense<0.000000e+00> : vector<4x192xf32>
    %78 = tpu.matmul %77, %11, %cst_14 {dimension_numbers = #tpu.dot_dimension_numbers<[1], [0], [0], [1], [0, 0, 1, 1], [], []>} : vector<4x64xf32>, vector<64x192xf32>, vector<4x192xf32> -> vector<4x192xf32>
    %79 = vector.extract_strided_slice %78 {offsets = [0, 0], sizes = [4, 96], strides = [1, 1]} : vector<4x192xf32> to vector<4x96xf32>
    %80 = vector.extract_strided_slice %78 {offsets = [0, 96], sizes = [2, 96], strides = [1, 1]} : vector<4x192xf32> to vector<2x96xf32>
    %81 = vector.broadcast %6 : vector<1x96xf32> to vector<2x96xf32>
    %82 = arith.addf %80, %81 : vector<2x96xf32>
    %83 = vector.extract_strided_slice %15 {offsets = [4, 0], sizes = [2, 96], strides = [1, 1]} : vector<16x96xf32> to vector<2x96xf32>
    %84 = tpu.concatenate %83, %82 in 0 : vector<2x96xf32>, vector<2x96xf32> -> vector<4x96xf32>
    %85 = vector.extract_strided_slice %84 {offsets = [0, 0], sizes = [4, 64], strides = [1, 1]} : vector<4x96xf32> to vector<4x64xf32>
    %86 = vector.extract_strided_slice %79 {offsets = [0, 0], sizes = [4, 64], strides = [1, 1]} : vector<4x96xf32> to vector<4x64xf32>
    %87 = arith.addf %85, %86 : vector<4x64xf32>
    %88 = arith.negf %87 : vector<4x64xf32>
    %89 = math.exp %88 : vector<4x64xf32>
    %cst_15 = arith.constant 1.000000e+00 : f32
    %90 = vector.broadcast %cst_15 : f32 to vector<4x64xf32>
    %91 = arith.addf %90, %89 : vector<4x64xf32>
    %92 = arith.divf %90, %91 : vector<4x64xf32>
    %93 = vector.extract_strided_slice %92 {offsets = [0, 0], sizes = [4, 32], strides = [1, 1]} : vector<4x64xf32> to vector<4x32xf32>
    %94 = vector.extract_strided_slice %92 {offsets = [0, 32], sizes = [4, 32], strides = [1, 1]} : vector<4x64xf32> to vector<4x32xf32>
    %95 = vector.extract_strided_slice %84 {offsets = [0, 64], sizes = [4, 32], strides = [1, 1]} : vector<4x96xf32> to vector<4x32xf32>
    %96 = vector.extract_strided_slice %79 {offsets = [0, 64], sizes = [4, 32], strides = [1, 1]} : vector<4x96xf32> to vector<4x32xf32>
    %97 = arith.addf %96, %20 : vector<4x32xf32>
    %98 = arith.mulf %93, %97 : vector<4x32xf32>
    %99 = arith.addf %95, %98 : vector<4x32xf32>
    %100 = math.tanh %99 : vector<4x32xf32>
    %101 = arith.subf %74, %100 : vector<4x32xf32>
    %102 = arith.mulf %94, %101 : vector<4x32xf32>
    %103 = arith.addf %100, %102 : vector<4x32xf32>
    %104 = arith.mulf %103, %25 : vector<4x32xf32>
    %105 = arith.mulf %103, %27 : vector<4x32xf32>
    %106 = tpu.concatenate %104, %105 in 1 : vector<4x32xf32>, vector<4x32xf32> -> vector<4x64xf32>
    %cst_16 = arith.constant dense<0.000000e+00> : vector<4x192xf32>
    %107 = tpu.matmul %106, %11, %cst_16 {dimension_numbers = #tpu.dot_dimension_numbers<[1], [0], [0], [1], [0, 0, 1, 1], [], []>} : vector<4x64xf32>, vector<64x192xf32>, vector<4x192xf32> -> vector<4x192xf32>
    %108 = vector.extract_strided_slice %107 {offsets = [0, 0], sizes = [4, 96], strides = [1, 1]} : vector<4x192xf32> to vector<4x96xf32>
    %109 = vector.extract_strided_slice %107 {offsets = [0, 96], sizes = [2, 96], strides = [1, 1]} : vector<4x192xf32> to vector<2x96xf32>
    %110 = vector.broadcast %6 : vector<1x96xf32> to vector<2x96xf32>
    %111 = arith.addf %109, %110 : vector<2x96xf32>
    %112 = vector.extract_strided_slice %15 {offsets = [6, 0], sizes = [2, 96], strides = [1, 1]} : vector<16x96xf32> to vector<2x96xf32>
    %113 = tpu.concatenate %112, %111 in 0 : vector<2x96xf32>, vector<2x96xf32> -> vector<4x96xf32>
    %114 = vector.extract_strided_slice %113 {offsets = [0, 0], sizes = [4, 64], strides = [1, 1]} : vector<4x96xf32> to vector<4x64xf32>
    %115 = vector.extract_strided_slice %108 {offsets = [0, 0], sizes = [4, 64], strides = [1, 1]} : vector<4x96xf32> to vector<4x64xf32>
    %116 = arith.addf %114, %115 : vector<4x64xf32>
    %117 = arith.negf %116 : vector<4x64xf32>
    %118 = math.exp %117 : vector<4x64xf32>
    %cst_17 = arith.constant 1.000000e+00 : f32
    %119 = vector.broadcast %cst_17 : f32 to vector<4x64xf32>
    %120 = arith.addf %119, %118 : vector<4x64xf32>
    %121 = arith.divf %119, %120 : vector<4x64xf32>
    %122 = vector.extract_strided_slice %121 {offsets = [0, 0], sizes = [4, 32], strides = [1, 1]} : vector<4x64xf32> to vector<4x32xf32>
    %123 = vector.extract_strided_slice %121 {offsets = [0, 32], sizes = [4, 32], strides = [1, 1]} : vector<4x64xf32> to vector<4x32xf32>
    %124 = vector.extract_strided_slice %113 {offsets = [0, 64], sizes = [4, 32], strides = [1, 1]} : vector<4x96xf32> to vector<4x32xf32>
    %125 = vector.extract_strided_slice %108 {offsets = [0, 64], sizes = [4, 32], strides = [1, 1]} : vector<4x96xf32> to vector<4x32xf32>
    %126 = arith.addf %125, %20 : vector<4x32xf32>
    %127 = arith.mulf %122, %126 : vector<4x32xf32>
    %128 = arith.addf %124, %127 : vector<4x32xf32>
    %129 = math.tanh %128 : vector<4x32xf32>
    %130 = arith.subf %103, %129 : vector<4x32xf32>
    %131 = arith.mulf %123, %130 : vector<4x32xf32>
    %132 = arith.addf %129, %131 : vector<4x32xf32>
    %133 = arith.mulf %132, %25 : vector<4x32xf32>
    %134 = arith.mulf %132, %27 : vector<4x32xf32>
    %135 = tpu.concatenate %133, %134 in 1 : vector<4x32xf32>, vector<4x32xf32> -> vector<4x64xf32>
    %cst_18 = arith.constant dense<0.000000e+00> : vector<4x192xf32>
    %136 = tpu.matmul %135, %11, %cst_18 {dimension_numbers = #tpu.dot_dimension_numbers<[1], [0], [0], [1], [0, 0, 1, 1], [], []>} : vector<4x64xf32>, vector<64x192xf32>, vector<4x192xf32> -> vector<4x192xf32>
    %137 = vector.extract_strided_slice %136 {offsets = [0, 0], sizes = [4, 96], strides = [1, 1]} : vector<4x192xf32> to vector<4x96xf32>
    %138 = vector.extract_strided_slice %136 {offsets = [0, 96], sizes = [2, 96], strides = [1, 1]} : vector<4x192xf32> to vector<2x96xf32>
    %139 = vector.broadcast %6 : vector<1x96xf32> to vector<2x96xf32>
    %140 = arith.addf %138, %139 : vector<2x96xf32>
    %141 = vector.extract_strided_slice %15 {offsets = [8, 0], sizes = [2, 96], strides = [1, 1]} : vector<16x96xf32> to vector<2x96xf32>
    %142 = tpu.concatenate %141, %140 in 0 : vector<2x96xf32>, vector<2x96xf32> -> vector<4x96xf32>
    %143 = vector.extract_strided_slice %142 {offsets = [0, 0], sizes = [4, 64], strides = [1, 1]} : vector<4x96xf32> to vector<4x64xf32>
    %144 = vector.extract_strided_slice %137 {offsets = [0, 0], sizes = [4, 64], strides = [1, 1]} : vector<4x96xf32> to vector<4x64xf32>
    %145 = arith.addf %143, %144 : vector<4x64xf32>
    %146 = arith.negf %145 : vector<4x64xf32>
    %147 = math.exp %146 : vector<4x64xf32>
    %cst_19 = arith.constant 1.000000e+00 : f32
    %148 = vector.broadcast %cst_19 : f32 to vector<4x64xf32>
    %149 = arith.addf %148, %147 : vector<4x64xf32>
    %150 = arith.divf %148, %149 : vector<4x64xf32>
    %151 = vector.extract_strided_slice %150 {offsets = [0, 0], sizes = [4, 32], strides = [1, 1]} : vector<4x64xf32> to vector<4x32xf32>
    %152 = vector.extract_strided_slice %150 {offsets = [0, 32], sizes = [4, 32], strides = [1, 1]} : vector<4x64xf32> to vector<4x32xf32>
    %153 = vector.extract_strided_slice %142 {offsets = [0, 64], sizes = [4, 32], strides = [1, 1]} : vector<4x96xf32> to vector<4x32xf32>
    %154 = vector.extract_strided_slice %137 {offsets = [0, 64], sizes = [4, 32], strides = [1, 1]} : vector<4x96xf32> to vector<4x32xf32>
    %155 = arith.addf %154, %20 : vector<4x32xf32>
    %156 = arith.mulf %151, %155 : vector<4x32xf32>
    %157 = arith.addf %153, %156 : vector<4x32xf32>
    %158 = math.tanh %157 : vector<4x32xf32>
    %159 = arith.subf %132, %158 : vector<4x32xf32>
    %160 = arith.mulf %152, %159 : vector<4x32xf32>
    %161 = arith.addf %158, %160 : vector<4x32xf32>
    %162 = arith.mulf %161, %25 : vector<4x32xf32>
    %163 = arith.mulf %161, %27 : vector<4x32xf32>
    %164 = tpu.concatenate %162, %163 in 1 : vector<4x32xf32>, vector<4x32xf32> -> vector<4x64xf32>
    %cst_20 = arith.constant dense<0.000000e+00> : vector<4x192xf32>
    %165 = tpu.matmul %164, %11, %cst_20 {dimension_numbers = #tpu.dot_dimension_numbers<[1], [0], [0], [1], [0, 0, 1, 1], [], []>} : vector<4x64xf32>, vector<64x192xf32>, vector<4x192xf32> -> vector<4x192xf32>
    %166 = vector.extract_strided_slice %165 {offsets = [0, 0], sizes = [4, 96], strides = [1, 1]} : vector<4x192xf32> to vector<4x96xf32>
    %167 = vector.extract_strided_slice %165 {offsets = [0, 96], sizes = [2, 96], strides = [1, 1]} : vector<4x192xf32> to vector<2x96xf32>
    %168 = vector.broadcast %6 : vector<1x96xf32> to vector<2x96xf32>
    %169 = arith.addf %167, %168 : vector<2x96xf32>
    %170 = vector.extract_strided_slice %15 {offsets = [10, 0], sizes = [2, 96], strides = [1, 1]} : vector<16x96xf32> to vector<2x96xf32>
    %171 = tpu.concatenate %170, %169 in 0 : vector<2x96xf32>, vector<2x96xf32> -> vector<4x96xf32>
    %172 = vector.extract_strided_slice %171 {offsets = [0, 0], sizes = [4, 64], strides = [1, 1]} : vector<4x96xf32> to vector<4x64xf32>
    %173 = vector.extract_strided_slice %166 {offsets = [0, 0], sizes = [4, 64], strides = [1, 1]} : vector<4x96xf32> to vector<4x64xf32>
    %174 = arith.addf %172, %173 : vector<4x64xf32>
    %175 = arith.negf %174 : vector<4x64xf32>
    %176 = math.exp %175 : vector<4x64xf32>
    %cst_21 = arith.constant 1.000000e+00 : f32
    %177 = vector.broadcast %cst_21 : f32 to vector<4x64xf32>
    %178 = arith.addf %177, %176 : vector<4x64xf32>
    %179 = arith.divf %177, %178 : vector<4x64xf32>
    %180 = vector.extract_strided_slice %179 {offsets = [0, 0], sizes = [4, 32], strides = [1, 1]} : vector<4x64xf32> to vector<4x32xf32>
    %181 = vector.extract_strided_slice %179 {offsets = [0, 32], sizes = [4, 32], strides = [1, 1]} : vector<4x64xf32> to vector<4x32xf32>
    %182 = vector.extract_strided_slice %171 {offsets = [0, 64], sizes = [4, 32], strides = [1, 1]} : vector<4x96xf32> to vector<4x32xf32>
    %183 = vector.extract_strided_slice %166 {offsets = [0, 64], sizes = [4, 32], strides = [1, 1]} : vector<4x96xf32> to vector<4x32xf32>
    %184 = arith.addf %183, %20 : vector<4x32xf32>
    %185 = arith.mulf %180, %184 : vector<4x32xf32>
    %186 = arith.addf %182, %185 : vector<4x32xf32>
    %187 = math.tanh %186 : vector<4x32xf32>
    %188 = arith.subf %161, %187 : vector<4x32xf32>
    %189 = arith.mulf %181, %188 : vector<4x32xf32>
    %190 = arith.addf %187, %189 : vector<4x32xf32>
    %191 = arith.mulf %190, %25 : vector<4x32xf32>
    %192 = arith.mulf %190, %27 : vector<4x32xf32>
    %193 = tpu.concatenate %191, %192 in 1 : vector<4x32xf32>, vector<4x32xf32> -> vector<4x64xf32>
    %cst_22 = arith.constant dense<0.000000e+00> : vector<4x192xf32>
    %194 = tpu.matmul %193, %11, %cst_22 {dimension_numbers = #tpu.dot_dimension_numbers<[1], [0], [0], [1], [0, 0, 1, 1], [], []>} : vector<4x64xf32>, vector<64x192xf32>, vector<4x192xf32> -> vector<4x192xf32>
    %195 = vector.extract_strided_slice %194 {offsets = [0, 0], sizes = [4, 96], strides = [1, 1]} : vector<4x192xf32> to vector<4x96xf32>
    %196 = vector.extract_strided_slice %194 {offsets = [0, 96], sizes = [2, 96], strides = [1, 1]} : vector<4x192xf32> to vector<2x96xf32>
    %197 = vector.broadcast %6 : vector<1x96xf32> to vector<2x96xf32>
    %198 = arith.addf %196, %197 : vector<2x96xf32>
    %199 = vector.extract_strided_slice %15 {offsets = [12, 0], sizes = [2, 96], strides = [1, 1]} : vector<16x96xf32> to vector<2x96xf32>
    %200 = tpu.concatenate %199, %198 in 0 : vector<2x96xf32>, vector<2x96xf32> -> vector<4x96xf32>
    %201 = vector.extract_strided_slice %200 {offsets = [0, 0], sizes = [4, 64], strides = [1, 1]} : vector<4x96xf32> to vector<4x64xf32>
    %202 = vector.extract_strided_slice %195 {offsets = [0, 0], sizes = [4, 64], strides = [1, 1]} : vector<4x96xf32> to vector<4x64xf32>
    %203 = arith.addf %201, %202 : vector<4x64xf32>
    %204 = arith.negf %203 : vector<4x64xf32>
    %205 = math.exp %204 : vector<4x64xf32>
    %cst_23 = arith.constant 1.000000e+00 : f32
    %206 = vector.broadcast %cst_23 : f32 to vector<4x64xf32>
    %207 = arith.addf %206, %205 : vector<4x64xf32>
    %208 = arith.divf %206, %207 : vector<4x64xf32>
    %209 = vector.extract_strided_slice %208 {offsets = [0, 0], sizes = [4, 32], strides = [1, 1]} : vector<4x64xf32> to vector<4x32xf32>
    %210 = vector.extract_strided_slice %208 {offsets = [0, 32], sizes = [4, 32], strides = [1, 1]} : vector<4x64xf32> to vector<4x32xf32>
    %211 = vector.extract_strided_slice %200 {offsets = [0, 64], sizes = [4, 32], strides = [1, 1]} : vector<4x96xf32> to vector<4x32xf32>
    %212 = vector.extract_strided_slice %195 {offsets = [0, 64], sizes = [4, 32], strides = [1, 1]} : vector<4x96xf32> to vector<4x32xf32>
    %213 = arith.addf %212, %20 : vector<4x32xf32>
    %214 = arith.mulf %209, %213 : vector<4x32xf32>
    %215 = arith.addf %211, %214 : vector<4x32xf32>
    %216 = math.tanh %215 : vector<4x32xf32>
    %217 = arith.subf %190, %216 : vector<4x32xf32>
    %218 = arith.mulf %210, %217 : vector<4x32xf32>
    %219 = arith.addf %216, %218 : vector<4x32xf32>
    %220 = arith.mulf %219, %25 : vector<4x32xf32>
    %221 = arith.mulf %219, %27 : vector<4x32xf32>
    %222 = tpu.concatenate %220, %221 in 1 : vector<4x32xf32>, vector<4x32xf32> -> vector<4x64xf32>
    %cst_24 = arith.constant dense<0.000000e+00> : vector<4x192xf32>
    %223 = tpu.matmul %222, %11, %cst_24 {dimension_numbers = #tpu.dot_dimension_numbers<[1], [0], [0], [1], [0, 0, 1, 1], [], []>} : vector<4x64xf32>, vector<64x192xf32>, vector<4x192xf32> -> vector<4x192xf32>
    %224 = vector.extract_strided_slice %223 {offsets = [0, 0], sizes = [4, 96], strides = [1, 1]} : vector<4x192xf32> to vector<4x96xf32>
    %225 = vector.extract_strided_slice %223 {offsets = [0, 96], sizes = [2, 96], strides = [1, 1]} : vector<4x192xf32> to vector<2x96xf32>
    %226 = vector.broadcast %6 : vector<1x96xf32> to vector<2x96xf32>
    %227 = arith.addf %225, %226 : vector<2x96xf32>
    %228 = vector.extract_strided_slice %15 {offsets = [14, 0], sizes = [2, 96], strides = [1, 1]} : vector<16x96xf32> to vector<2x96xf32>
    %229 = tpu.concatenate %228, %227 in 0 : vector<2x96xf32>, vector<2x96xf32> -> vector<4x96xf32>
    %230 = vector.extract_strided_slice %229 {offsets = [0, 0], sizes = [4, 64], strides = [1, 1]} : vector<4x96xf32> to vector<4x64xf32>
    %231 = vector.extract_strided_slice %224 {offsets = [0, 0], sizes = [4, 64], strides = [1, 1]} : vector<4x96xf32> to vector<4x64xf32>
    %232 = arith.addf %230, %231 : vector<4x64xf32>
    %233 = arith.negf %232 : vector<4x64xf32>
    %234 = math.exp %233 : vector<4x64xf32>
    %cst_25 = arith.constant 1.000000e+00 : f32
    %235 = vector.broadcast %cst_25 : f32 to vector<4x64xf32>
    %236 = arith.addf %235, %234 : vector<4x64xf32>
    %237 = arith.divf %235, %236 : vector<4x64xf32>
    %238 = vector.extract_strided_slice %237 {offsets = [0, 0], sizes = [4, 32], strides = [1, 1]} : vector<4x64xf32> to vector<4x32xf32>
    %239 = vector.extract_strided_slice %237 {offsets = [0, 32], sizes = [4, 32], strides = [1, 1]} : vector<4x64xf32> to vector<4x32xf32>
    %240 = vector.extract_strided_slice %229 {offsets = [0, 64], sizes = [4, 32], strides = [1, 1]} : vector<4x96xf32> to vector<4x32xf32>
    %241 = vector.extract_strided_slice %224 {offsets = [0, 64], sizes = [4, 32], strides = [1, 1]} : vector<4x96xf32> to vector<4x32xf32>
    %242 = arith.addf %241, %20 : vector<4x32xf32>
    %243 = arith.mulf %238, %242 : vector<4x32xf32>
    %244 = arith.addf %240, %243 : vector<4x32xf32>
    %245 = math.tanh %244 : vector<4x32xf32>
    %246 = arith.subf %219, %245 : vector<4x32xf32>
    %247 = arith.mulf %239, %246 : vector<4x32xf32>
    %248 = arith.addf %245, %247 : vector<4x32xf32>
    %249 = arith.mulf %248, %25 : vector<4x32xf32>
    %250 = arith.mulf %248, %27 : vector<4x32xf32>
    %251 = tpu.concatenate %249, %250 in 1 : vector<4x32xf32>, vector<4x32xf32> -> vector<4x64xf32>
    %cst_26 = arith.constant dense<0.000000e+00> : vector<4x192xf32>
    %252 = tpu.matmul %251, %11, %cst_26 {dimension_numbers = #tpu.dot_dimension_numbers<[1], [0], [0], [1], [0, 0, 1, 1], [], []>} : vector<4x64xf32>, vector<64x192xf32>, vector<4x192xf32> -> vector<4x192xf32>
    %253 = vector.extract_strided_slice %252 {offsets = [0, 0], sizes = [4, 96], strides = [1, 1]} : vector<4x192xf32> to vector<4x96xf32>
    %254 = vector.extract_strided_slice %252 {offsets = [0, 96], sizes = [2, 96], strides = [1, 1]} : vector<4x192xf32> to vector<2x96xf32>
    %255 = vector.broadcast %6 : vector<1x96xf32> to vector<2x96xf32>
    %256 = arith.addf %254, %255 : vector<2x96xf32>
    %cst_27 = arith.constant 0.000000e+00 : f32
    %257 = vector.broadcast %cst_27 : f32 to vector<2x96xf32>
    %258 = tpu.concatenate %257, %256 in 0 : vector<2x96xf32>, vector<2x96xf32> -> vector<4x96xf32>
    %259 = vector.extract_strided_slice %258 {offsets = [0, 0], sizes = [4, 64], strides = [1, 1]} : vector<4x96xf32> to vector<4x64xf32>
    %260 = vector.extract_strided_slice %253 {offsets = [0, 0], sizes = [4, 64], strides = [1, 1]} : vector<4x96xf32> to vector<4x64xf32>
    %261 = arith.addf %259, %260 : vector<4x64xf32>
    %262 = arith.negf %261 : vector<4x64xf32>
    %263 = math.exp %262 : vector<4x64xf32>
    %cst_28 = arith.constant 1.000000e+00 : f32
    %264 = vector.broadcast %cst_28 : f32 to vector<4x64xf32>
    %265 = arith.addf %264, %263 : vector<4x64xf32>
    %266 = arith.divf %264, %265 : vector<4x64xf32>
    %267 = vector.extract_strided_slice %266 {offsets = [0, 0], sizes = [4, 32], strides = [1, 1]} : vector<4x64xf32> to vector<4x32xf32>
    %268 = vector.extract_strided_slice %266 {offsets = [0, 32], sizes = [4, 32], strides = [1, 1]} : vector<4x64xf32> to vector<4x32xf32>
    %269 = vector.extract_strided_slice %258 {offsets = [0, 64], sizes = [4, 32], strides = [1, 1]} : vector<4x96xf32> to vector<4x32xf32>
    %270 = vector.extract_strided_slice %253 {offsets = [0, 64], sizes = [4, 32], strides = [1, 1]} : vector<4x96xf32> to vector<4x32xf32>
    %271 = arith.addf %270, %20 : vector<4x32xf32>
    %272 = arith.mulf %267, %271 : vector<4x32xf32>
    %273 = arith.addf %269, %272 : vector<4x32xf32>
    %274 = math.tanh %273 : vector<4x32xf32>
    %275 = arith.subf %248, %274 : vector<4x32xf32>
    %276 = arith.mulf %268, %275 : vector<4x32xf32>
    %277 = arith.addf %274, %276 : vector<4x32xf32>
    %278 = vector.extract_strided_slice %277 {offsets = [2, 0], sizes = [2, 32], strides = [1, 1]} : vector<4x32xf32> to vector<2x32xf32>
    %cst_29 = arith.constant dense<0.000000e+00> : vector<2x4xf32>
    %279 = tpu.matmul %278, %9, %cst_29 {dimension_numbers = #tpu.dot_dimension_numbers<[1], [0], [0], [1], [0, 0, 1, 1], [], []>} : vector<2x32xf32>, vector<32x4xf32>, vector<2x4xf32> -> vector<2x4xf32>
    %280 = vector.broadcast %10 : vector<1x4xf32> to vector<2x4xf32>
    %281 = arith.addf %279, %280 : vector<2x4xf32>
    %c0_30 = arith.constant 0 : index
    %c0_31 = arith.constant 0 : index
    %282 = vector.load %arg3[%c0_30, %c0_31] : memref<2x4xf32, #tpu.memory_space<vmem>>, vector<2x4xf32>
    tpu.vector_store %arg3[%c0_30, %c0_31], %281 {strides = array<i32>} : memref<2x4xf32, #tpu.memory_space<vmem>>, vector<2x4xf32>,
    return
  }
}

</mosaic_0001>

<bundles_post_ra>
// kernel: tfnaive_forward.1
= control target key start
LH: loop header
LB: loop body
LE: loop exit
PB: predicated region body
PF: predicated region fallthrough
CT: control target
= control target key end

     0   :  { %8 = vsyncpa [#allocation3], 0  ;;  %s1689_s0 = inlined_call_operand.vmem [shape: f32[16,4], index: 0, kind: input, shape index: {}]   ;;  %s1690_s1 = inlined_call_operand.hbm [shape: f32[160,128], index: 1, kind: input, shape index: {}]   ;;  %s1691_s2 = inlined_call_operand.hbm [shape: f32[64,192], index: 2, kind: input, shape index: {}]   ;;  %s1692_s3 = inlined_call_operand.hbm [shape: f32[2,4], index: 3, kind: output, shape index: {}]  }
   0x1   :  { %9 = vsyncpa [#allocation6], 0 }
   0x2   :  { %10 = vsyncpa [#allocation4], 0  ;;  %s17_s14 = sshll.u32 %s1690_s1, 4  ;;  %s1273_s15 = smov [#allocation2]   ;;  %s18_s14 = int_to_ptr.hbm [resolvable:$true] %s17_s14 }
   0x3   :  { %s19_s16 = sshll.u32 %s1273_s15, 4  ;;  %s30_s19 = sshll.u32 %s1691_s2, 4  ;;  %s20_s16 = int_to_ptr.vmem [resolvable:$true] %s19_s16  ;;  %s31_s19 = int_to_ptr.hbm [resolvable:$true] %s30_s19 }
   0x4   :  { %s1274_s20 = smov 128   ;;  %s1275_s21 = smov 8  }
   0x5   :  { %25 = dma.hbm_to_vmem [thread:$0]  %s18_s14, 2560, %s20_s16, [#allocation3], %s1274_s20, %s1274_s20, %s1275_s21  }
   0x6   :  { %s1276_s22 = smov [#allocation5]   ;;  %s1277_s24 = smov 256  }
   0x7   :  { %s32_s23 = sshll.u32 %s1276_s22, 4  ;;  %s1278_s25 = smov 16   ;;  %s33_s23 = int_to_ptr.vmem [resolvable:$true] %s32_s23 }
   0x8   :  { %38 = dma.hbm_to_vmem [thread:$0]  %s31_s19, 2048, %s33_s23, [#allocation6], %s1277_s24, %s1277_s24, %s1278_s25  }
   0x9   :  { %1267 = dma.done.wait [#allocation3], 2560  }
   0xa   :  { %1268 = vsyncadd [#allocation3], 4294964736 }
   0xb   :  { %1269 = dma.done.wait [#allocation6], 2048  }
   0xc   :  { %1270 = vsyncadd [#allocation6], 4294965248  ;;  %vm81_vm0 = vcmask 1043456   ;;  %vm74_vm1 = vcmask 31744   ;;  %v47_v0 = vld [vmem:[#allocation2] sm:$0xf]  ;;  %v112_v38 = vlaneseq }
   0xd   :  { %v71_v1 = vld [vmem:[%s1689_s0] sm:$0xff]  ;;  %1099 = vmatpush.msk.msra.mxu0 %vm81_vm0, %v47_v0  ;;  %v1314_v2 = vld [vmem:[#allocation2 + $0x28] sm:$0x3]  ;;  %s1279_s2 = smov 64   ;;  %s1280_s27 = smov 96   ;;  %v1328_v24 = vld [vmem:[#allocation5 + $0x70] sm:$0xff] }
   0xe   :  { %1100 = vmatmul.msk.f32.vlgmr.msra.gmra.mxu0 %vm74_vm1, %v71_v1  ;;  %v73_v3 = vperm.slane %v1314_v2, 0  ;;  %v108_v15 = vperm.slane %v1314_v2, 1  ;;  %v1330_v25 = vld [vmem:[#allocation5 + $0x78] sm:$0xff]  ;;  %v1332_v26 = vld [vmem:[#allocation5 + $0x60] sm:$0xff]  ;;  %171 = vmatpush.msra.mxu1 %v1328_v24  ;;  %v1336_v27 = vld [vmem:[#allocation5 + $0x68] sm:$0xff]  ;;  %v113_v39 = vshrl.u32 %v112_v38, 7 }
   0xf   :  { %191 = vmatpush.msra.mxu2 %v1330_v25  ;;  %v1338_v28 = vld [vmem:[#allocation5 + $0x50] sm:$0xff]  ;;  %v1340_v29 = vld [vmem:[#allocation5 + $0x58] sm:$0xff]  ;;  %293 = vmatpush.msra.mxu3 %v1328_v24  ;;  %v1346_v30 = vld [vmem:[#allocation5 + $0x40] sm:$0xff]  ;;  %vm110_vm6 = vcmask 1041408   ;;  %v1281_v43 = vmov 0.0   ;;  %vm157_vm8 = vcmask 261120  }
  0x10   :  { %313 = vmatpush.msrb.mxu0 %v1330_v25  ;;  %172 = vmatpush.msra.mxu1 %v1332_v26  ;;  %v1348_v31 = vld [vmem:[#allocation5 + $0x48] sm:$0xff]  ;;  %v1354_v32 = vld [vmem:[#allocation5 + $0x30] sm:$0xff]  ;;  %v1356_v33 = vld [vmem:[#allocation5 + $0x38] sm:$0xff]  ;;  %vm114_vm7 = vcmp.lt.s32.totalorder %v113_v39, 2  ;;  %vm159_vm9 = vcmask 523264   ;;  %s1282_s28 = smov 32  }
  0x11   :  { %192 = vmatpush.msra.mxu2 %v1336_v27  ;;  %294 = vmatpush.msra.mxu3 %v1332_v26  ;;  %v1362_v34 = vld [vmem:[#allocation5 + $0x20] sm:$0xff]  ;;  %v1364_v35 = vld [vmem:[#allocation5 + $0x28] sm:$0xff]  ;;  %v1370_v36 = vld [vmem:[#allocation5 + $0x10] sm:$0xff]  ;;  %v1384_v44 = vsel %vm114_vm7, 1.0, %v1281_v43  ;;  %s1088_s7 = sshll.u32 %s1692_s3, 4  ;;  %s1089_s7 = int_to_ptr.hbm [resolvable:$true] %s1088_s7 }
  0x12   :  { %314 = vmatpush.msrb.mxu0 %v1336_v27  ;;  %173 = vmatpush.msra.mxu1 %v1338_v28  ;;  %v1372_v37 = vld [vmem:[#allocation5 + $0x18] sm:$0xff]  ;;  %v1392_v47 = vld [vmem:[#allocation5] sm:$0xff]  ;;  %v1394_v48 = vld [vmem:[#allocation5 + $0x8] sm:$0xff]  ;;  %v1438_v53 = vsub.f32 1.0, %v1384_v44 }
  0x13   :  { %193 = vmatpush.msra.mxu2 %v1340_v29  ;;  %295 = vmatpush.msra.mxu3 %v1338_v28  ;;  %v49_v49 = vld [vmem:[#allocation2 + $0x70] sm:$0x3] }
  0x14   :  { %315 = vmatpush.msrb.mxu0 %v1340_v29  ;;  %174 = vmatpush.msra.mxu1 %v1346_v30  ;;  %v203_v50 = vperm.slane %v49_v49, 0  ;;  %v109_v51 = vperm.slane %v49_v49, 1 }
  0x15   :  { %194 = vmatpush.msra.mxu2 %v1348_v31  ;;  %296 = vmatpush.msra.mxu3 %v1346_v30 }
  0x16   :  { %316 = vmatpush.msrb.mxu0 %v1348_v31  ;;  %175 = vmatpush.msra.mxu1 %v1354_v32  ;;  %v111_v52 = vsel %vm110_vm6, %v108_v15, %v109_v51 }
  0x17   :  { %195 = vmatpush.msra.mxu2 %v1356_v33  ;;  %297 = vmatpush.msra.mxu3 %v1354_v32 }
  0x18   :  { %317 = vmatpush.msrb.mxu0 %v1356_v33  ;;  %176 = vmatpush.msra.mxu1 %v1362_v34 }
  0x19   :  { %196 = vmatpush.msra.mxu2 %v1364_v35  ;;  %298 = vmatpush.msra.mxu3 %v1362_v34 }
  0x1a   :  { %318 = vmatpush.msrb.mxu0 %v1364_v35  ;;  %177 = vmatpush.msra.mxu1 %v1370_v36 }
  0x1b   :  { %197 = vmatpush.msra.mxu2 %v1372_v37  ;;  %299 = vmatpush.msra.mxu3 %v1370_v36 }
  0x1c   :  { %319 = vmatpush.msrb.mxu0 %v1372_v37  ;;  %178 = vmatpush.msra.mxu1 %v1392_v47 }
  0x1d   :  { %198 = vmatpush.msra.mxu2 %v1394_v48  ;;  %300 = vmatpush.msra.mxu3 %v1392_v47 }
  0x1e   :  { %320 = vmatpush.msrb.mxu0 %v1394_v48  ;;  %405 = vmatpush.msrb.mxu1 %v1328_v24 }
  0x1f   :  { %425 = vmatpush.msrb.mxu2 %v1330_v25  ;;  %517 = vmatpush.msrb.mxu3 %v1328_v24 }
  0x20   :  { %537 = vmatpush.msra.mxu0 %v1330_v25  ;;  %406 = vmatpush.msrb.mxu1 %v1332_v26 }
  0x21   :  { %245 = vrot.lane.b32.xlu2 %v111_v52, %s1279_s2  ;;  %426 = vmatpush.msrb.mxu2 %v1336_v27 }
  0x22   :  { %407 = vmatpush.msrb.mxu1 %v1338_v28  ;;  %518 = vmatpush.msrb.mxu3 %v1332_v26 }
  0x23   :  { %427 = vmatpush.msrb.mxu2 %v1340_v29  ;;  %538 = vmatpush.msra.mxu0 %v1336_v27 }
  0x24   :  { %408 = vmatpush.msrb.mxu1 %v1346_v30  ;;  %519 = vmatpush.msrb.mxu3 %v1338_v28 }
  0x25   :  { %428 = vmatpush.msrb.mxu2 %v1348_v31  ;;  %539 = vmatpush.msra.mxu0 %v1340_v29 }
  0x26   :  { %409 = vmatpush.msrb.mxu1 %v1354_v32  ;;  %520 = vmatpush.msrb.mxu3 %v1346_v30 }
  0x27   :  { %429 = vmatpush.msrb.mxu2 %v1356_v33  ;;  %540 = vmatpush.msra.mxu0 %v1348_v31 }
  0x28   :  { %410 = vmatpush.msrb.mxu1 %v1362_v34  ;;  %521 = vmatpush.msrb.mxu3 %v1354_v32 }
  0x29   :  { %430 = vmatpush.msrb.mxu2 %v1364_v35  ;;  %541 = vmatpush.msra.mxu0 %v1356_v33 }
  0x2a   :  { %411 = vmatpush.msrb.mxu1 %v1370_v36  ;;  %522 = vmatpush.msrb.mxu3 %v1362_v34 }
  0x2b   :  { %431 = vmatpush.msrb.mxu2 %v1372_v37  ;;  %542 = vmatpush.msra.mxu0 %v1364_v35 }
  0x2c   :  { %412 = vmatpush.msrb.mxu1 %v1392_v47  ;;  %523 = vmatpush.msrb.mxu3 %v1370_v36 }
  0x2d   :  { %432 = vmatpush.msrb.mxu2 %v1394_v48  ;;  %543 = vmatpush.msra.mxu0 %v1372_v37 }
  0x2e   :  { %524 = vmatpush.msrb.mxu3 %v1392_v47 }
  0x2f   :  { %544 = vmatpush.msra.mxu0 %v1394_v48 }
  0x7b   :  { %v1461_v57 = vpop.permute.xlu2 %245 }
  0x8b   :  { %v102_v4 = vpop.f32.mrf.mxu0 }
  0x8c   :  { %v1319_v5 = vadd.f32 %v102_v4, %v73_v3 }
  0x8e   :  { %v1103_v6 = vmul.f32 -1.442695, %v1319_v5 }
  0x90   :  { %1141 = vpow2.f32 %v1103_v6  ;;  %v211_v6 = vrot.slane %v1319_v5, 2 }
  0x96   :  { %v1142_v7 = vpop.eup %1141 }
  0x97   :  { %v121_v8 = vadd.f32 1.0, %v1142_v7 }
  0x99   :  { %1143 = vrcp.f32 %v121_v8  ;;  %v133_v12 = vand.u32 2147483648, %v121_v8  ;;  %v131_v14 = vand.u32 2147483647, %v121_v8  ;;  %vm127_vm3 = vweird.f32 %v121_v8 }
  0x9b   :  { %v134_v17 = vor.u32 1.1754944e-38, %v133_v12  ;;  %vm132_vm5 = vcmp.eq.f32.partialorder %v131_v14, 8.507059e+37 }
  0x9f   :  { %v1144_v9 = vpop.eup %1143 }
  0xa0   :  { %v123_v10 = vmul.f32 %v1144_v9, %v121_v8  ;;  %vm128_vm2 = vweird.f32 %v1144_v9 }
  0xa1   :  { %vm129_vm4 = vmor %vm127_vm3, %vm128_vm2 }
  0xa2   :  { %v124_v11 = vsub.f32 1.0, %v123_v10 }
  0xa4   :  { %v125_v13 = vmul.f32 %v1144_v9, %v124_v11 }
  0xa6   :  { %v126_v16 = vadd.f32 %v1144_v9, %v125_v13 }
  0xa8   :  { %v130_v18 = vsel %vm129_vm4, %v1144_v9, %v126_v16 }
  0xa9   :  { %v135_v19 = vsel %vm132_vm5, %v134_v17, %v130_v18 }
  0xaa   :  { %v137_v20 = vmul.f32 %v135_v19, %v108_v15  ;;  %v144_v40 = vsub.f32 1.0, %v135_v19 }
  0xac   :  { %139 = vrot.lane.b32.xlu0 %v137_v20, %s1279_s2 }
 0x11e   :  { %v140_v21 = vpop.permute.xlu0 %139 }
 0x11f   :  { %v142_v22 = vadd.f32 %v140_v21, %v1319_v5 }
 0x121   :  { %1145 = vtanh.f32 %v142_v22 }
 0x127   :  { %v1146_v23 = vpop.eup %1145 }
 0x128   :  { %146 = vrot.lane.b32.xlu0 %v1146_v23, %s1280_s27 }
 0x19a   :  { %v147_v41 = vpop.permute.xlu0 %146 }
 0x19b   :  { %v149_v42 = vmul.f32 %v147_v41, %v144_v40 }
 0x19d   :  { %v1387_v45 = vsel %vm110_vm6, %v149_v42, 0.0 }
 0x19e   :  { %v151_v46 = vmul.f32 %v1384_v44, %v1387_v45  ;;  %v152_v54 = vmul.f32 %v1387_v45, %v1438_v53 }
 0x1a0   :  { %154 = vrot.lane.b32.xlu1 %v151_v46, %s1280_s27 }
 0x1a8   :  { %205 = vrot.lane.b32.xlu1 %v203_v50, %s1280_s27 }
 0x212   :  { %v155_v55 = vpop.permute.xlu1 %154 }
 0x213   :  { %v158_v56 = vsel %vm157_vm8, %v155_v55, %v152_v54 }
 0x214   :  { %1104 = vmatmul.msk.f32.vlgmr.msra.gmra.mxu1 %vm159_vm9, %v158_v56  ;;  %1105 = vmatmul.msk.f32.vlgmr.msra.gmra.mxu2 %vm159_vm9, %v158_v56 }
 0x215   :  { %627 = vmatpush.msra.mxu1 %v1328_v24  ;;  %647 = vmatpush.msra.mxu2 %v1330_v25 }
 0x217   :  { %628 = vmatpush.msra.mxu1 %v1332_v26  ;;  %648 = vmatpush.msra.mxu2 %v1336_v27 }
 0x219   :  { %629 = vmatpush.msra.mxu1 %v1338_v28  ;;  %649 = vmatpush.msra.mxu2 %v1340_v29 }
 0x21a   :  { %v1463_v58 = vpop.permute.xlu1 %205 }
 0x21b   :  { %630 = vmatpush.msra.mxu1 %v1346_v30  ;;  %650 = vmatpush.msra.mxu2 %v1348_v31 }
 0x21d   :  { %631 = vmatpush.msra.mxu1 %v1354_v32  ;;  %651 = vmatpush.msra.mxu2 %v1356_v33 }
 0x21f   :  { %632 = vmatpush.msra.mxu1 %v1362_v34  ;;  %652 = vmatpush.msra.mxu2 %v1364_v35 }
 0x221   :  { %633 = vmatpush.msra.mxu1 %v1370_v36  ;;  %653 = vmatpush.msra.mxu2 %v1372_v37 }
 0x223   :  { %634 = vmatpush.msra.mxu1 %v1392_v47  ;;  %654 = vmatpush.msra.mxu2 %v1394_v48 }
 0x291   :  { %v180_v59 = vpop.f32.mrf.mxu1 }
 0x292   :  { %v248_v60 = vadd.f32 %v1461_v57, %v180_v59  ;;  %v208_v61 = vadd.f32 %v1463_v58, %v180_v59 }
 0x294   :  { %250 = vrot.lane.b32.xlu1 %v248_v60, %s1279_s2  ;;  %v215_v62 = vrot.slane %v208_v61, 6 }
 0x296   :  { %217 = vrot.lane.b32.xlu2 %v215_v62, %s1282_s28 }
 0x297   :  { %v200_v63 = vpop.f32.mrf.mxu2 }
 0x298   :  { %v209_v0 = vadd.f32 %v1463_v58, %v200_v63 }
 0x29a   :  { %v216_v1 = vrot.slane %v209_v0, 6 }
 0x29c   :  { %219 = vrot.lane.b32.xlu0 %v216_v1, %s1282_s28 }
 0x2f0   :  { %v218_v4 = vpop.permute.xlu2 %217 }
 0x306   :  { %v251_v23 = vpop.permute.xlu1 %250 }
 0x30e   :  { %v220_v7 = vpop.permute.xlu0 %219 }
 0x30f   :  { %v221_v8 = vsel %vm157_vm8, %v218_v4, %v220_v7 }
 0x310   :  { %v223_v9 = vsel %vm110_vm6, %v211_v6, %v221_v8  ;;  %v327_v8 = vrot.slane %v1319_v5, 4 }
 0x311   :  { %v224_v10 = vadd.f32 %v223_v9, %v180_v59 }
 0x313   :  { %v1106_v11 = vmul.f32 -1.442695, %v224_v10 }
 0x315   :  { %1147 = vpow2.f32 %v1106_v11 }
 0x31b   :  { %v1148_v12 = vpop.eup %1147 }
 0x31c   :  { %v228_v13 = vadd.f32 1.0, %v1148_v12 }
 0x31e   :  { %1149 = vrcp.f32 %v228_v13  ;;  %v240_v17 = vand.u32 2147483648, %v228_v13  ;;  %v238_v19 = vand.u32 2147483647, %v228_v13  ;;  %vm234_vm11 = vweird.f32 %v228_v13 }
 0x320   :  { %v241_v21 = vor.u32 1.1754944e-38, %v240_v17  ;;  %vm239_vm13 = vcmp.eq.f32.partialorder %v238_v19, 8.507059e+37 }
 0x324   :  { %v1150_v14 = vpop.eup %1149 }
 0x325   :  { %v230_v15 = vmul.f32 %v1150_v14, %v228_v13  ;;  %vm235_vm10 = vweird.f32 %v1150_v14 }
 0x326   :  { %vm236_vm12 = vmor %vm234_vm11, %vm235_vm10 }
 0x327   :  { %v231_v16 = vsub.f32 1.0, %v230_v15 }
 0x329   :  { %v232_v18 = vmul.f32 %v1150_v14, %v231_v16 }
 0x32b   :  { %v233_v20 = vadd.f32 %v1150_v14, %v232_v18 }
 0x32d   :  { %v237_v22 = vsel %vm236_vm12, %v1150_v14, %v233_v20 }
 0x32e   :  { %v242_v38 = vsel %vm239_vm13, %v241_v21, %v237_v22 }
 0x32f   :  { %v253_v39 = vmul.f32 %v251_v23, %v242_v38 }
 0x331   :  { %255 = vrot.lane.b32.xlu2 %v253_v39, %s1279_s2 }
 0x38b   :  { %v256_v40 = vpop.permute.xlu2 %255 }
 0x38c   :  { %v258_v41 = vadd.f32 %v256_v40, %v223_v9 }
 0x38e   :  { %1151 = vtanh.f32 %v258_v41 }
 0x394   :  { %v1152_v42 = vpop.eup %1151 }
 0x395   :  { %261 = vrot.lane.b32.xlu0 %v1152_v42, %s1280_s27 }
 0x407   :  { %v262_v43 = vpop.permute.xlu0 %261 }
 0x408   :  { %v264_v46 = vsub.f32 %v1387_v45, %v262_v43  ;;  %v72_v45 = vld [vmem:[%s1689_s0 + $0x8] sm:$0xff]  ;;  %s1283_s0 = smov [#allocation7]  }
 0x409   :  { %1101 = vmatmul.msk.f32.gmra.mxu0 %vm74_vm1, %v72_v45  ;;  %s1086_s4 = sshll.u32 %s1283_s0, 4  ;;  %s1087_s4 = int_to_ptr.vmem [resolvable:$true] %s1086_s4 }
 0x40a   :  { %v265_v49 = vmul.f32 %v264_v46, %v242_v38 }
 0x40c   :  { %267 = vrot.lane.b32.xlu1 %v265_v49, %s1282_s28 }
 0x47e   :  { %v268_v50 = vpop.permute.xlu1 %267 }
 0x47f   :  { %v1478_v51 = vadd.f32 %v1152_v42, %v268_v50 }
 0x481   :  { %v272_v52 = vmul.f32 %v1478_v51, %v1438_v53  ;;  %v271_v54 = vmul.f32 %v1384_v44, %v1478_v51 }
 0x483   :  { %278 = vrot.lane.b32.xlu0 %v272_v52, %s1280_s27  ;;  %274 = vrot.lane.b32.xlu2 %v271_v54, %s1279_s2 }
 0x486   :  { %v1509_v60 = vpop.f32.mrf.mxu0 }
 0x4dd   :  { %v275_v55 = vpop.permute.xlu2 %274 }
 0x4f5   :  { %v279_v56 = vpop.permute.xlu0 %278 }
 0x4f6   :  { %v281_v59 = vsel %vm157_vm8, %v275_v55, %v279_v56 }
 0x4f7   :  { %1107 = vmatmul.msk.f32.vlgmr.msra.gmra.mxu3 %vm159_vm9, %v281_v59  ;;  %1108 = vmatmul.msk.f32.vlgmr.msrb.gmra.mxu0 %vm159_vm9, %v281_v59 }
 0x4f8   :  { %740 = vmatpush.msra.mxu3 %v1328_v24  ;;  %760 = vmatpush.msrb.mxu0 %v1330_v25 }
 0x4fa   :  { %741 = vmatpush.msra.mxu3 %v1332_v26  ;;  %761 = vmatpush.msrb.mxu0 %v1336_v27 }
 0x4fc   :  { %742 = vmatpush.msra.mxu3 %v1338_v28  ;;  %762 = vmatpush.msrb.mxu0 %v1340_v29 }
 0x4fe   :  { %743 = vmatpush.msra.mxu3 %v1346_v30  ;;  %763 = vmatpush.msrb.mxu0 %v1348_v31 }
 0x500   :  { %744 = vmatpush.msra.mxu3 %v1354_v32  ;;  %764 = vmatpush.msrb.mxu0 %v1356_v33 }
 0x502   :  { %745 = vmatpush.msra.mxu3 %v1362_v34  ;;  %765 = vmatpush.msrb.mxu0 %v1364_v35 }
 0x504   :  { %746 = vmatpush.msra.mxu3 %v1370_v36  ;;  %766 = vmatpush.msrb.mxu0 %v1372_v37 }
 0x506   :  { %747 = vmatpush.msra.mxu3 %v1392_v47  ;;  %767 = vmatpush.msrb.mxu0 %v1394_v48 }
 0x574   :  { %v322_v61 = vpop.f32.mrf.mxu0 }
 0x575   :  { %v326_v62 = vadd.f32 %v322_v61, %v1463_v58 }
 0x577   :  { %v332_v63 = vrot.slane %v326_v62, 6 }
 0x579   :  { %335 = vrot.lane.b32.xlu2 %v332_v63, %s1282_s28 }
 0x57a   :  { %v302_v0 = vpop.f32.mrf.mxu3 }
 0x57b   :  { %v325_v1 = vadd.f32 %v302_v0, %v1463_v58  ;;  %v360_v4 = vadd.f32 %v302_v0, %v1461_v57 }
 0x57d   :  { %362 = vrot.lane.b32.xlu0 %v360_v4, %s1279_s2  ;;  %v331_v6 = vrot.slane %v325_v1, 6 }
 0x57f   :  { %333 = vrot.lane.b32.xlu1 %v331_v6, %s1282_s28 }
 0x5d3   :  { %v336_v7 = vpop.permute.xlu2 %335 }
 0x5ef   :  { %v363_v39 = vpop.permute.xlu0 %362 }
 0x5f1   :  { %v334_v9 = vpop.permute.xlu1 %333 }
 0x5f2   :  { %v337_v10 = vsel %vm157_vm8, %v334_v9, %v336_v7  ;;  %v439_v9 = vrot.slane %v1319_v5, 6 }
 0x5f3   :  { %v339_v11 = vsel %vm110_vm6, %v327_v8, %v337_v10 }
 0x5f4   :  { %v340_v12 = vadd.f32 %v339_v11, %v302_v0 }
 0x5f6   :  { %v1109_v13 = vmul.f32 -1.442695, %v340_v12 }
 0x5f8   :  { %1153 = vpow2.f32 %v1109_v13 }
 0x5fe   :  { %v1154_v14 = vpop.eup %1153 }
 0x5ff   :  { %v344_v15 = vadd.f32 1.0, %v1154_v14 }
 0x601   :  { %1155 = vrcp.f32 %v344_v15  ;;  %v356_v19 = vand.u32 2147483648, %v344_v15  ;;  %v354_v21 = vand.u32 2147483647, %v344_v15  ;;  %vm350_vm15 = vweird.f32 %v344_v15 }
 0x603   :  { %v357_v23 = vor.u32 1.1754944e-38, %v356_v19  ;;  %vm355_vm1 = vcmp.eq.f32.partialorder %v354_v21, 8.507059e+37 }
 0x607   :  { %v1156_v16 = vpop.eup %1155 }
 0x608   :  { %v346_v17 = vmul.f32 %v1156_v16, %v344_v15  ;;  %vm351_vm14 = vweird.f32 %v1156_v16 }
 0x609   :  { %vm352_vm0 = vmor %vm350_vm15, %vm351_vm14 }
 0x60a   :  { %v347_v18 = vsub.f32 1.0, %v346_v17 }
 0x60c   :  { %v348_v20 = vmul.f32 %v1156_v16, %v347_v18 }
 0x60e   :  { %v349_v22 = vadd.f32 %v1156_v16, %v348_v20 }
 0x610   :  { %v353_v38 = vsel %vm352_vm0, %v1156_v16, %v349_v22 }
 0x611   :  { %v358_v40 = vsel %vm355_vm1, %v357_v23, %v353_v38 }
 0x612   :  { %v365_v41 = vmul.f32 %v363_v39, %v358_v40 }
 0x614   :  { %367 = vrot.lane.b32.xlu1 %v365_v41, %s1279_s2 }
 0x686   :  { %v368_v42 = vpop.permute.xlu1 %367 }
 0x687   :  { %v370_v43 = vadd.f32 %v368_v42, %v339_v11 }
 0x689   :  { %1157 = vtanh.f32 %v370_v43 }
 0x68f   :  { %v1158_v46 = vpop.eup %1157 }
 0x690   :  { %v372_v49 = vsub.f32 %v1478_v51, %v1158_v46 }
 0x692   :  { %374 = vrot.lane.b32.xlu2 %v372_v49, %s1280_s27 }
 0x6ec   :  { %v375_v50 = vpop.permute.xlu2 %374 }
 0x6ed   :  { %v377_v52 = vmul.f32 %v375_v50, %v358_v40 }
 0x6ef   :  { %379 = vrot.lane.b32.xlu0 %v377_v52, %s1282_s28 }
 0x761   :  { %v380_v54 = vpop.permute.xlu0 %379 }
 0x762   :  { %v1524_v45 = vadd.f32 %v1158_v46, %v380_v54 }
 0x764   :  { %v384_v55 = vmul.f32 %v1524_v45, %v1438_v53  ;;  %v383_v56 = vmul.f32 %v1384_v44, %v1524_v45 }
 0x766   :  { %390 = vrot.lane.b32.xlu2 %v384_v55, %s1280_s27  ;;  %386 = vrot.lane.b32.xlu1 %v383_v56, %s1279_s2 }
 0x7c0   :  { %v391_v51 = vpop.permute.xlu2 %390 }
 0x7d8   :  { %v387_v59 = vpop.permute.xlu1 %386 }
 0x7d9   :  { %v393_v61 = vsel %vm157_vm8, %v387_v59, %v391_v51 }
 0x7da   :  { %1110 = vmatmul.msk.f32.vlgmr.msrb.gmra.mxu1 %vm159_vm9, %v393_v61  ;;  %1111 = vmatmul.msk.f32.vlgmr.msrb.gmra.mxu2 %vm159_vm9, %v393_v61 }
 0x7db   :  { %852 = vmatpush.msrb.mxu1 %v1328_v24  ;;  %872 = vmatpush.msrb.mxu2 %v1330_v25 }
 0x7dd   :  { %853 = vmatpush.msrb.mxu1 %v1332_v26  ;;  %873 = vmatpush.msrb.mxu2 %v1336_v27 }
 0x7df   :  { %854 = vmatpush.msrb.mxu1 %v1338_v28  ;;  %874 = vmatpush.msrb.mxu2 %v1340_v29 }
 0x7e1   :  { %855 = vmatpush.msrb.mxu1 %v1346_v30  ;;  %875 = vmatpush.msrb.mxu2 %v1348_v31 }
 0x7e3   :  { %856 = vmatpush.msrb.mxu1 %v1354_v32  ;;  %876 = vmatpush.msrb.mxu2 %v1356_v33 }
 0x7e5   :  { %857 = vmatpush.msrb.mxu1 %v1362_v34  ;;  %877 = vmatpush.msrb.mxu2 %v1364_v35 }
 0x7e7   :  { %858 = vmatpush.msrb.mxu1 %v1370_v36  ;;  %878 = vmatpush.msrb.mxu2 %v1372_v37 }
 0x7e9   :  { %859 = vmatpush.msrb.mxu1 %v1392_v47  ;;  %879 = vmatpush.msrb.mxu2 %v1394_v48 }
 0x857   :  { %v414_v62 = vpop.f32.mrf.mxu1 }
 0x858   :  { %v437_v63 = vadd.f32 %v414_v62, %v1463_v58  ;;  %v472_v0 = vadd.f32 %v414_v62, %v1461_v57 }
 0x85a   :  { %474 = vrot.lane.b32.xlu2 %v472_v0, %s1279_s2  ;;  %v443_v1 = vrot.slane %v437_v63, 6 }
 0x85c   :  { %445 = vrot.lane.b32.xlu0 %v443_v1, %s1282_s28 }
 0x85d   :  { %v434_v4 = vpop.f32.mrf.mxu2 }
 0x85e   :  { %v438_v6 = vadd.f32 %v434_v4, %v1463_v58 }
 0x860   :  { %v444_v7 = vrot.slane %v438_v6, 6 }
 0x862   :  { %447 = vrot.lane.b32.xlu1 %v444_v7, %s1282_s28 }
 0x8b4   :  { %v475_v39 = vpop.permute.xlu2 %474 }
 0x8ce   :  { %v446_v8 = vpop.permute.xlu0 %445 }
 0x8d4   :  { %v448_v10 = vpop.permute.xlu1 %447 }
 0x8d5   :  { %v449_v11 = vsel %vm157_vm8, %v446_v8, %v448_v10 }
 0x8d6   :  { %v451_v12 = vsel %vm110_vm6, %v439_v9, %v449_v11 }
 0x8d7   :  { %v452_v13 = vadd.f32 %v451_v12, %v414_v62 }
 0x8d9   :  { %v1112_v14 = vmul.f32 -1.442695, %v452_v13 }
 0x8db   :  { %1159 = vpow2.f32 %v1112_v14 }
 0x8e1   :  { %v1160_v15 = vpop.eup %1159 }
 0x8e2   :  { %v456_v16 = vadd.f32 1.0, %v1160_v15 }
 0x8e4   :  { %1161 = vrcp.f32 %v456_v16  ;;  %v468_v20 = vand.u32 2147483648, %v456_v16  ;;  %v466_v22 = vand.u32 2147483647, %v456_v16  ;;  %vm462_vm3 = vweird.f32 %v456_v16 }
 0x8e6   :  { %v469_v5 = vor.u32 1.1754944e-38, %v468_v20  ;;  %vm467_vm5 = vcmp.eq.f32.partialorder %v466_v22, 8.507059e+37 }
 0x8ea   :  { %v1162_v17 = vpop.eup %1161 }
 0x8eb   :  { %v458_v18 = vmul.f32 %v1162_v17, %v456_v16  ;;  %vm463_vm2 = vweird.f32 %v1162_v17 }
 0x8ec   :  { %vm464_vm4 = vmor %vm462_vm3, %vm463_vm2 }
 0x8ed   :  { %v459_v19 = vsub.f32 1.0, %v458_v18 }
 0x8ef   :  { %v460_v21 = vmul.f32 %v1162_v17, %v459_v19 }
 0x8f1   :  { %v461_v23 = vadd.f32 %v1162_v17, %v460_v21 }
 0x8f3   :  { %v465_v38 = vsel %vm464_vm4, %v1162_v17, %v461_v23 }
 0x8f4   :  { %v470_v40 = vsel %vm467_vm5, %v469_v5, %v465_v38 }
 0x8f5   :  { %v477_v41 = vmul.f32 %v475_v39, %v470_v40 }
 0x8f7   :  { %479 = vrot.lane.b32.xlu0 %v477_v41, %s1279_s2 }
 0x969   :  { %v480_v42 = vpop.permute.xlu0 %479 }
 0x96a   :  { %v482_v43 = vadd.f32 %v480_v42, %v451_v12 }
 0x96c   :  { %1163 = vtanh.f32 %v482_v43 }
 0x972   :  { %v1164_v46 = vpop.eup %1163 }
 0x973   :  { %v484_v49 = vsub.f32 %v1524_v45, %v1164_v46 }
 0x975   :  { %486 = vrot.lane.b32.xlu1 %v484_v49, %s1280_s27 }
 0x9e7   :  { %v487_v50 = vpop.permute.xlu1 %486 }
 0x9e8   :  { %v489_v52 = vmul.f32 %v487_v50, %v470_v40 }
 0x9ea   :  { %491 = vrot.lane.b32.xlu2 %v489_v52, %s1282_s28 }
 0xa44   :  { %v492_v54 = vpop.permute.xlu2 %491 }
 0xa45   :  { %v1564_v55 = vadd.f32 %v1164_v46, %v492_v54 }
 0xa47   :  { %v496_v56 = vmul.f32 %v1564_v55, %v1438_v53  ;;  %v495_v51 = vmul.f32 %v1384_v44, %v1564_v55 }
 0xa49   :  { %502 = vrot.lane.b32.xlu1 %v496_v56, %s1280_s27  ;;  %498 = vrot.lane.b32.xlu0 %v495_v51, %s1279_s2 }
 0xabb   :  { %v503_v45 = vpop.permute.xlu1 %502  ;;  %v499_v59 = vpop.permute.xlu0 %498 }
 0xabc   :  { %v505_v61 = vsel %vm157_vm8, %v499_v59, %v503_v45 }
 0xabd   :  { %1113 = vmatmul.msk.f32.vlgmr.msrb.gmra.mxu3 %vm159_vm9, %v505_v61  ;;  %1114 = vmatmul.msk.f32.vlgmr.msra.gmra.mxu0 %vm159_vm9, %v505_v61 }
 0xabe   :  { %964 = vmatpush.msrb.mxu3 %v1328_v24  ;;  %984 = vmatpush.msra.mxu0 %v1330_v25 }
 0xac0   :  { %965 = vmatpush.msrb.mxu3 %v1332_v26  ;;  %985 = vmatpush.msra.mxu0 %v1336_v27 }
 0xac2   :  { %966 = vmatpush.msrb.mxu3 %v1338_v28  ;;  %986 = vmatpush.msra.mxu0 %v1340_v29 }
 0xac4   :  { %967 = vmatpush.msrb.mxu3 %v1346_v30  ;;  %987 = vmatpush.msra.mxu0 %v1348_v31  ;;  %v1600_v31 = vadd.f32 %v1509_v60, %v73_v3 }
 0xac6   :  { %968 = vmatpush.msrb.mxu3 %v1354_v32  ;;  %988 = vmatpush.msra.mxu0 %v1356_v33  ;;  %v662_v46 = vrot.slane %v1600_v31, 2 }
 0xac8   :  { %969 = vmatpush.msrb.mxu3 %v1362_v34  ;;  %989 = vmatpush.msra.mxu0 %v1364_v35 }
 0xaca   :  { %970 = vmatpush.msrb.mxu3 %v1370_v36  ;;  %990 = vmatpush.msra.mxu0 %v1372_v37 }
 0xacc   :  { %971 = vmatpush.msrb.mxu3 %v1392_v47  ;;  %991 = vmatpush.msra.mxu0 %v1394_v48 }
 0xb3a   :  { %v546_v24 = vpop.f32.mrf.mxu0 }
 0xb3b   :  { %v550_v25 = vadd.f32 %v546_v24, %v1463_v58 }
 0xb3d   :  { %v554_v26 = vrot.slane %v550_v25, 6 }
 0xb3f   :  { %557 = vrot.lane.b32.xlu0 %v554_v26, %s1282_s28 }
 0xb40   :  { %v526_v27 = vpop.f32.mrf.mxu3 }
 0xb41   :  { %v549_v28 = vadd.f32 %v526_v27, %v1463_v58  ;;  %v582_v29 = vadd.f32 %v526_v27, %v1461_v57 }
 0xb43   :  { %584 = vrot.lane.b32.xlu1 %v582_v29, %s1279_s2  ;;  %v553_v30 = vrot.slane %v549_v28, 6 }
 0xb45   :  { %555 = vrot.lane.b32.xlu2 %v553_v30, %s1282_s28 }
 0xb9f   :  { %v556_v32 = vpop.permute.xlu2 %555 }
 0xbb1   :  { %v558_v33 = vpop.permute.xlu0 %557 }
 0xbb2   :  { %v559_v34 = vsel %vm157_vm8, %v556_v32, %v558_v33 }
 0xbb3   :  { %v561_v35 = vsel %vm110_vm6, %v1600_v31, %v559_v34 }
 0xbb4   :  { %v562_v36 = vadd.f32 %v561_v35, %v526_v27 }
 0xbb5   :  { %v585_v7 = vpop.permute.xlu1 %584 }
 0xbb6   :  { %v1115_v37 = vmul.f32 -1.442695, %v562_v36 }
 0xbb8   :  { %1165 = vpow2.f32 %v1115_v37 }
 0xbbe   :  { %v1166_v47 = vpop.eup %1165 }
 0xbbf   :  { %v566_v48 = vadd.f32 1.0, %v1166_v47 }
 0xbc1   :  { %1167 = vrcp.f32 %v566_v48  ;;  %v578_v2 = vand.u32 2147483648, %v566_v48  ;;  %v576_v3 = vand.u32 2147483647, %v566_v48  ;;  %vm572_vm10 = vweird.f32 %v566_v48 }
 0xbc3   :  { %v579_v4 = vor.u32 1.1754944e-38, %v578_v2  ;;  %vm577_vm12 = vcmp.eq.f32.partialorder %v576_v3, 8.507059e+37 }
 0xbc7   :  { %v1168_v62 = vpop.eup %1167 }
 0xbc8   :  { %v568_v63 = vmul.f32 %v1168_v62, %v566_v48  ;;  %vm573_vm7 = vweird.f32 %v1168_v62 }
 0xbc9   :  { %vm574_vm11 = vmor %vm572_vm10, %vm573_vm7 }
 0xbca   :  { %v569_v0 = vsub.f32 1.0, %v568_v63 }
 0xbcc   :  { %v570_v1 = vmul.f32 %v1168_v62, %v569_v0 }
 0xbce   :  { %v571_v60 = vadd.f32 %v1168_v62, %v570_v1 }
 0xbd0   :  { %v575_v6 = vsel %vm574_vm11, %v1168_v62, %v571_v60 }
 0xbd1   :  { %v580_v8 = vsel %vm577_vm12, %v579_v4, %v575_v6 }
 0xbd2   :  { %v587_v9 = vmul.f32 %v585_v7, %v580_v8 }
 0xbd4   :  { %589 = vrot.lane.b32.xlu2 %v587_v9, %s1279_s2 }
 0xc2e   :  { %v590_v10 = vpop.permute.xlu2 %589 }
 0xc2f   :  { %v592_v11 = vadd.f32 %v590_v10, %v561_v35 }
 0xc31   :  { %1169 = vtanh.f32 %v592_v11 }
 0xc37   :  { %v1170_v12 = vpop.eup %1169 }
 0xc38   :  { %v594_v13 = vsub.f32 %v1564_v55, %v1170_v12 }
 0xc3a   :  { %596 = vrot.lane.b32.xlu0 %v594_v13, %s1280_s27  ;;  %v774_v13 = vrot.slane %v1600_v31, 4 }
 0xcac   :  { %v597_v14 = vpop.permute.xlu0 %596 }
 0xcad   :  { %v599_v15 = vmul.f32 %v597_v14, %v580_v8 }
 0xcaf   :  { %601 = vrot.lane.b32.xlu1 %v599_v15, %s1282_s28 }
 0xd21   :  { %v602_v16 = vpop.permute.xlu1 %601 }
 0xd22   :  { %v604_v17 = vadd.f32 %v1170_v12, %v602_v16 }
 0xd24   :  { %v606_v18 = vmul.f32 %v604_v17, %v1438_v53  ;;  %v605_v19 = vmul.f32 %v1384_v44, %v604_v17 }
 0xd26   :  { %612 = vrot.lane.b32.xlu0 %v606_v18, %s1280_s27  ;;  %608 = vrot.lane.b32.xlu2 %v605_v19, %s1279_s2 }
 0xd80   :  { %v609_v20 = vpop.permute.xlu2 %608 }
 0xd98   :  { %v613_v21 = vpop.permute.xlu0 %612 }
 0xd99   :  { %v615_v22 = vsel %vm157_vm8, %v609_v20, %v613_v21 }
 0xd9a   :  { %1116 = vmatmul.msk.f32.vlgmr.msra.gmra.mxu1 %vm159_vm9, %v615_v22  ;;  %1117 = vmatmul.msk.f32.vlgmr.msra.gmra.mxu2 %vm159_vm9, %v615_v22 }
 0xe17   :  { %v636_v23 = vpop.f32.mrf.mxu1 }
 0xe18   :  { %v659_v5 = vadd.f32 %v636_v23, %v1463_v58  ;;  %v695_v38 = vadd.f32 %v636_v23, %v1461_v57 }
 0xe1a   :  { %697 = vrot.lane.b32.xlu0 %v695_v38, %s1279_s2  ;;  %v666_v39 = vrot.slane %v659_v5, 6 }
 0xe1c   :  { %668 = vrot.lane.b32.xlu1 %v666_v39, %s1282_s28 }
 0xe1d   :  { %v656_v40 = vpop.f32.mrf.mxu2 }
 0xe1e   :  { %v660_v41 = vadd.f32 %v656_v40, %v1463_v58 }
 0xe20   :  { %v667_v42 = vrot.slane %v660_v41, 6 }
 0xe22   :  { %670 = vrot.lane.b32.xlu2 %v667_v42, %s1282_s28 }
 0xe7c   :  { %v671_v43 = vpop.permute.xlu2 %670 }
 0xe8c   :  { %v698_v30 = vpop.permute.xlu0 %697 }
 0xe8e   :  { %v669_v49 = vpop.permute.xlu1 %668 }
 0xe8f   :  { %v672_v50 = vsel %vm157_vm8, %v669_v49, %v671_v43 }
 0xe90   :  { %v674_v52 = vsel %vm110_vm6, %v662_v46, %v672_v50 }
 0xe91   :  { %v675_v54 = vadd.f32 %v674_v52, %v636_v23 }
 0xe93   :  { %v1118_v55 = vmul.f32 -1.442695, %v675_v54 }
 0xe95   :  { %1171 = vpow2.f32 %v1118_v55 }
 0xe9b   :  { %v1172_v56 = vpop.eup %1171 }
 0xe9c   :  { %v679_v51 = vadd.f32 1.0, %v1172_v56 }
 0xe9e   :  { %1173 = vrcp.f32 %v679_v51  ;;  %v691_v24 = vand.u32 2147483648, %v679_v51  ;;  %v689_v26 = vand.u32 2147483647, %v679_v51  ;;  %vm685_vm14 = vweird.f32 %v679_v51 }
 0xea0   :  { %v692_v28 = vor.u32 1.1754944e-38, %v691_v24  ;;  %vm690_vm0 = vcmp.eq.f32.partialorder %v689_v26, 8.507059e+37 }
 0xea4   :  { %v1174_v45 = vpop.eup %1173 }
 0xea5   :  { %v681_v59 = vmul.f32 %v1174_v45, %v679_v51  ;;  %vm686_vm13 = vweird.f32 %v1174_v45 }
 0xea6   :  { %vm687_vm15 = vmor %vm685_vm14, %vm686_vm13 }
 0xea7   :  { %v682_v61 = vsub.f32 1.0, %v681_v59 }
 0xea9   :  { %v683_v25 = vmul.f32 %v1174_v45, %v682_v61 }
 0xeab   :  { %v684_v27 = vadd.f32 %v1174_v45, %v683_v25 }
 0xead   :  { %v688_v29 = vsel %vm687_vm15, %v1174_v45, %v684_v27 }
 0xeae   :  { %v693_v32 = vsel %vm690_vm0, %v692_v28, %v688_v29 }
 0xeaf   :  { %v700_v33 = vmul.f32 %v698_v30, %v693_v32 }
 0xeb1   :  { %702 = vrot.lane.b32.xlu1 %v700_v33, %s1279_s2 }
 0xf23   :  { %v703_v34 = vpop.permute.xlu1 %702 }
 0xf24   :  { %v705_v35 = vadd.f32 %v703_v34, %v674_v52 }
 0xf26   :  { %1175 = vtanh.f32 %v705_v35 }
 0xf2c   :  { %v1176_v36 = vpop.eup %1175 }
 0xf2d   :  { %v707_v37 = vsub.f32 %v604_v17, %v1176_v36 }
 0xf2f   :  { %709 = vrot.lane.b32.xlu2 %v707_v37, %s1280_s27  ;;  %v886_v37 = vrot.slane %v1600_v31, 6 }
 0xf89   :  { %v710_v47 = vpop.permute.xlu2 %709 }
 0xf8a   :  { %v712_v48 = vmul.f32 %v710_v47, %v693_v32 }
 0xf8c   :  { %714 = vrot.lane.b32.xlu0 %v712_v48, %s1282_s28 }
 0xffe   :  { %v715_v62 = vpop.permute.xlu0 %714 }
 0xfff   :  { %v717_v63 = vadd.f32 %v1176_v36, %v715_v62 }
0x1001   :  { %v719_v0 = vmul.f32 %v717_v63, %v1438_v53  ;;  %v718_v2 = vmul.f32 %v1384_v44, %v717_v63 }
0x1003   :  { %725 = vrot.lane.b32.xlu2 %v719_v0, %s1280_s27  ;;  %721 = vrot.lane.b32.xlu1 %v718_v2, %s1279_s2 }
0x105d   :  { %v726_v1 = vpop.permute.xlu2 %725 }
0x1075   :  { %v722_v3 = vpop.permute.xlu1 %721 }
0x1076   :  { %v728_v60 = vsel %vm157_vm8, %v722_v3, %v726_v1 }
0x1077   :  { %1119 = vmatmul.msk.f32.vlgmr.msra.gmra.mxu3 %vm159_vm9, %v728_v60  ;;  %1120 = vmatmul.msk.f32.vlgmr.msrb.gmra.mxu0 %vm159_vm9, %v728_v60 }
0x10f4   :  { %v769_v4 = vpop.f32.mrf.mxu0 }
0x10f5   :  { %v773_v6 = vadd.f32 %v769_v4, %v1463_v58 }
0x10f7   :  { %v779_v7 = vrot.slane %v773_v6, 6 }
0x10f9   :  { %782 = vrot.lane.b32.xlu1 %v779_v7, %s1282_s28 }
0x10fa   :  { %v749_v8 = vpop.f32.mrf.mxu3 }
0x10fb   :  { %v772_v9 = vadd.f32 %v749_v8, %v1463_v58  ;;  %v807_v10 = vadd.f32 %v749_v8, %v1461_v57 }
0x10fd   :  { %809 = vrot.lane.b32.xlu2 %v807_v10, %s1279_s2  ;;  %v778_v11 = vrot.slane %v772_v9, 6 }
0x10ff   :  { %780 = vrot.lane.b32.xlu0 %v778_v11, %s1282_s28 }
0x1157   :  { %v810_v43 = vpop.permute.xlu2 %809 }
0x116b   :  { %v783_v12 = vpop.permute.xlu1 %782 }
0x1171   :  { %v781_v14 = vpop.permute.xlu0 %780 }
0x1172   :  { %v784_v15 = vsel %vm157_vm8, %v781_v14, %v783_v12 }
0x1173   :  { %v786_v16 = vsel %vm110_vm6, %v774_v13, %v784_v15 }
0x1174   :  { %v787_v17 = vadd.f32 %v786_v16, %v749_v8 }
0x1176   :  { %v1121_v18 = vmul.f32 -1.442695, %v787_v17 }
0x1178   :  { %1177 = vpow2.f32 %v1121_v18 }
0x117e   :  { %v1178_v19 = vpop.eup %1177 }
0x117f   :  { %v791_v20 = vadd.f32 1.0, %v1178_v19 }
0x1181   :  { %1179 = vrcp.f32 %v791_v20  ;;  %v803_v5 = vand.u32 2147483648, %v791_v20  ;;  %v801_v39 = vand.u32 2147483647, %v791_v20  ;;  %vm797_vm2 = vweird.f32 %v791_v20 }
0x1183   :  { %v804_v41 = vor.u32 1.1754944e-38, %v803_v5  ;;  %vm802_vm4 = vcmp.eq.f32.partialorder %v801_v39, 8.507059e+37 }
0x1187   :  { %v1180_v21 = vpop.eup %1179 }
0x1188   :  { %v793_v22 = vmul.f32 %v1180_v21, %v791_v20  ;;  %vm798_vm1 = vweird.f32 %v1180_v21 }
0x1189   :  { %vm799_vm3 = vmor %vm797_vm2, %vm798_vm1 }
0x118a   :  { %v794_v23 = vsub.f32 1.0, %v793_v22 }
0x118c   :  { %v795_v38 = vmul.f32 %v1180_v21, %v794_v23 }
0x118e   :  { %v796_v40 = vadd.f32 %v1180_v21, %v795_v38 }
0x1190   :  { %v800_v42 = vsel %vm799_vm3, %v1180_v21, %v796_v40 }
0x1191   :  { %v805_v46 = vsel %vm802_vm4, %v804_v41, %v800_v42 }
0x1192   :  { %v812_v49 = vmul.f32 %v810_v43, %v805_v46 }
0x1194   :  { %814 = vrot.lane.b32.xlu0 %v812_v49, %s1279_s2 }
0x1206   :  { %v815_v50 = vpop.permute.xlu0 %814 }
0x1207   :  { %v817_v52 = vadd.f32 %v815_v50, %v786_v16 }
0x1209   :  { %1181 = vtanh.f32 %v817_v52 }
0x120f   :  { %v1182_v54 = vpop.eup %1181 }
0x1210   :  { %v819_v55 = vsub.f32 %v717_v63, %v1182_v54 }
0x1212   :  { %821 = vrot.lane.b32.xlu1 %v819_v55, %s1280_s27 }
0x1284   :  { %v822_v56 = vpop.permute.xlu1 %821 }
0x1285   :  { %v824_v51 = vmul.f32 %v822_v56, %v805_v46 }
0x1287   :  { %826 = vrot.lane.b32.xlu2 %v824_v51, %s1282_s28 }
0x12e1   :  { %v827_v45 = vpop.permute.xlu2 %826 }
0x12e2   :  { %v829_v59 = vadd.f32 %v1182_v54, %v827_v45 }
0x12e4   :  { %v831_v61 = vmul.f32 %v829_v59, %v1438_v53  ;;  %v830_v24 = vmul.f32 %v1384_v44, %v829_v59 }
0x12e6   :  { %837 = vrot.lane.b32.xlu1 %v831_v61, %s1280_s27  ;;  %833 = vrot.lane.b32.xlu0 %v830_v24, %s1279_s2 }
0x1358   :  { %v838_v25 = vpop.permute.xlu1 %837  ;;  %v834_v26 = vpop.permute.xlu0 %833 }
0x1359   :  { %v840_v27 = vsel %vm157_vm8, %v834_v26, %v838_v25 }
0x135a   :  { %1122 = vmatmul.msk.f32.vlgmr.msrb.gmra.mxu1 %vm159_vm9, %v840_v27  ;;  %1123 = vmatmul.msk.f32.vlgmr.msrb.gmra.mxu2 %vm159_vm9, %v840_v27 }
0x13d7   :  { %v861_v28 = vpop.f32.mrf.mxu1 }
0x13d8   :  { %v884_v29 = vadd.f32 %v861_v28, %v1463_v58  ;;  %v919_v30 = vadd.f32 %v861_v28, %v1461_v57 }
0x13da   :  { %921 = vrot.lane.b32.xlu1 %v919_v30, %s1279_s2  ;;  %v890_v32 = vrot.slane %v884_v29, 6 }
0x13dc   :  { %892 = vrot.lane.b32.xlu2 %v890_v32, %s1282_s28 }
0x13dd   :  { %v881_v33 = vpop.f32.mrf.mxu2 }
0x13de   :  { %v885_v34 = vadd.f32 %v881_v33, %v1463_v58 }
0x13e0   :  { %v891_v35 = vrot.slane %v885_v34, 6 }
0x13e2   :  { %894 = vrot.lane.b32.xlu0 %v891_v35, %s1282_s28 }
0x1436   :  { %v893_v36 = vpop.permute.xlu2 %892 }
0x144c   :  { %v922_v11 = vpop.permute.xlu1 %921 }
0x1454   :  { %v895_v47 = vpop.permute.xlu0 %894 }
0x1455   :  { %v896_v48 = vsel %vm157_vm8, %v893_v36, %v895_v47 }
0x1456   :  { %v898_v62 = vsel %vm110_vm6, %v886_v37, %v896_v48  ;;  %v53_v48 = vld [vmem:[#allocation2 + $0x90] sm:$0xff] }
0x1457   :  { %v899_v63 = vadd.f32 %v898_v62, %v861_v28  ;;  %1071 = vmatpush.msra.mxu1 %v53_v48 }
0x1459   :  { %v1124_v0 = vmul.f32 -1.442695, %v899_v63  ;;  %v51_v63 = vld [vmem:[#allocation2 + $0x80] sm:$0xff] }
0x145b   :  { %1183 = vpow2.f32 %v1124_v0  ;;  %v50_v0 = vld [vmem:[#allocation2 + $0x78] sm:$0xff] }
0x1461   :  { %v1184_v2 = vpop.eup %1183 }
0x1462   :  { %v903_v1 = vadd.f32 1.0, %v1184_v2 }
0x1464   :  { %1185 = vrcp.f32 %v903_v1  ;;  %v915_v6 = vand.u32 2147483648, %v903_v1  ;;  %v913_v8 = vand.u32 2147483647, %v903_v1  ;;  %vm909_vm7 = vweird.f32 %v903_v1 }
0x1466   :  { %v916_v31 = vor.u32 1.1754944e-38, %v915_v6  ;;  %vm914_vm11 = vcmp.eq.f32.partialorder %v913_v8, 8.507059e+37 }
0x146a   :  { %v1186_v3 = vpop.eup %1185 }
0x146b   :  { %v905_v60 = vmul.f32 %v1186_v3, %v903_v1  ;;  %vm910_vm5 = vweird.f32 %v1186_v3 }
0x146c   :  { %vm911_vm10 = vmor %vm909_vm7, %vm910_vm5 }
0x146d   :  { %v906_v4 = vsub.f32 1.0, %v905_v60 }
0x146f   :  { %v907_v7 = vmul.f32 %v1186_v3, %v906_v4  ;;  %v1140_v4 = vld [vmem:[#allocation2 + $0x98] ss:$0 sm:$0xff] }
0x1471   :  { %v908_v9 = vadd.f32 %v1186_v3, %v907_v7 }
0x1473   :  { %v912_v10 = vsel %vm911_vm10, %v1186_v3, %v908_v9 }
0x1474   :  { %v917_v12 = vsel %vm914_vm11, %v916_v31, %v912_v10 }
0x1475   :  { %v924_v13 = vmul.f32 %v922_v11, %v917_v12 }
0x1477   :  { %926 = vrot.lane.b32.xlu2 %v924_v13, %s1279_s2 }
0x14d1   :  { %v927_v14 = vpop.permute.xlu2 %926 }
0x14d2   :  { %v929_v15 = vadd.f32 %v927_v14, %v898_v62  ;;  %v52_v62 = vld [vmem:[#allocation2 + $0x88] sm:$0xff] }
0x14d3   :  { %1072 = vmatpush.msra.mxu1 %v52_v62 }
0x14d4   :  { %1187 = vtanh.f32 %v929_v15 }
0x14d5   :  { %1073 = vmatpush.msra.mxu1 %v51_v63 }
0x14d7   :  { %1074 = vmatpush.msra.mxu1 %v50_v0 }
0x14da   :  { %v1188_v16 = vpop.eup %1187 }
0x14db   :  { %v931_v17 = vsub.f32 %v829_v59, %v1188_v16 }
0x14dd   :  { %933 = vrot.lane.b32.xlu0 %v931_v17, %s1280_s27 }
0x154f   :  { %v934_v18 = vpop.permute.xlu0 %933 }
0x1550   :  { %v936_v19 = vmul.f32 %v934_v18, %v917_v12 }
0x1552   :  { %938 = vrot.lane.b32.xlu1 %v936_v19, %s1282_s28 }
0x15c4   :  { %v939_v20 = vpop.permute.xlu1 %938 }
0x15c5   :  { %v941_v21 = vadd.f32 %v1188_v16, %v939_v20 }
0x15c7   :  { %v943_v22 = vmul.f32 %v941_v21, %v1438_v53  ;;  %v942_v23 = vmul.f32 %v1384_v44, %v941_v21 }
0x15c9   :  { %949 = vrot.lane.b32.xlu0 %v943_v22, %s1280_s27  ;;  %945 = vrot.lane.b32.xlu2 %v942_v23, %s1279_s2 }
0x1623   :  { %v946_v5 = vpop.permute.xlu2 %945 }
0x163b   :  { %v950_v38 = vpop.permute.xlu0 %949 }
0x163c   :  { %v952_v39 = vsel %vm157_vm8, %v946_v5, %v950_v38 }
0x163d   :  { %1125 = vmatmul.msk.f32.vlgmr.msrb.gmra.mxu3 %vm159_vm9, %v952_v39  ;;  %1126 = vmatmul.msk.f32.vlgmr.msra.gmra.mxu0 %vm159_vm9, %v952_v39 }
0x16ba   :  { %v993_v40 = vpop.f32.mrf.mxu0 }
0x16bb   :  { %v997_v41 = vadd.f32 %v993_v40, %v1463_v58 }
0x16bd   :  { %v1001_v42 = vrot.slane %v997_v41, 6 }
0x16bf   :  { %1004 = vrot.lane.b32.xlu2 %v1001_v42, %s1282_s28 }
0x16c0   :  { %v973_v53 = vpop.f32.mrf.mxu3 }
0x16c1   :  { %v996_v44 = vadd.f32 %v973_v53, %v1463_v58  ;;  %v1029_v43 = vadd.f32 %v973_v53, %v1461_v57 }
0x16c3   :  { %v1000_v46 = vrot.slane %v996_v44, 6  ;;  %1031 = vrot.lane.b32.xlu0 %v1029_v43, %s1279_s2 }
0x16c5   :  { %1002 = vrot.lane.b32.xlu1 %v1000_v46, %s1282_s28 }
0x1719   :  { %v1005_v49 = vpop.permute.xlu2 %1004 }
0x1735   :  { %v1032_v29 = vpop.permute.xlu0 %1031 }
0x1737   :  { %v1003_v50 = vpop.permute.xlu1 %1002 }
0x1738   :  { %v1006_v52 = vsel %vm157_vm8, %v1003_v50, %v1005_v49 }
0x1739   :  { %v1008_v54 = vsel %vm110_vm6, 0.0, %v1006_v52  ;;  %vm1079_vm6 = vcmask 25600  }
0x173a   :  { %v1009_v55 = vadd.f32 %v1008_v54, %v973_v53 }
0x173c   :  { %v1127_v56 = vmul.f32 -1.442695, %v1009_v55 }
0x173e   :  { %1189 = vpow2.f32 %v1127_v56 }
0x1744   :  { %v1190_v51 = vpop.eup %1189 }
0x1745   :  { %v1013_v45 = vadd.f32 1.0, %v1190_v51 }
0x1747   :  { %1191 = vrcp.f32 %v1013_v45  ;;  %v1025_v61 = vand.u32 2147483648, %v1013_v45  ;;  %v1023_v25 = vand.u32 2147483647, %v1013_v45  ;;  %vm1019_vm12 = vweird.f32 %v1013_v45 }
0x1749   :  { %v1026_v27 = vor.u32 1.1754944e-38, %v1025_v61  ;;  %vm1024_vm14 = vcmp.eq.f32.partialorder %v1023_v25, 8.507059e+37 }
0x174d   :  { %v1192_v58 = vpop.eup %1191 }
0x174e   :  { %v1015_v59 = vmul.f32 %v1192_v58, %v1013_v45  ;;  %vm1020_vm9 = vweird.f32 %v1192_v58 }
0x174f   :  { %vm1021_vm13 = vmor %vm1019_vm12, %vm1020_vm9 }
0x1750   :  { %v1016_v57 = vsub.f32 1.0, %v1015_v59 }
0x1752   :  { %v1017_v24 = vmul.f32 %v1192_v58, %v1016_v57 }
0x1754   :  { %v1018_v26 = vadd.f32 %v1192_v58, %v1017_v24 }
0x1756   :  { %v1022_v28 = vsel %vm1021_vm13, %v1192_v58, %v1018_v26 }
0x1757   :  { %v1027_v30 = vsel %vm1024_vm14, %v1026_v27, %v1022_v28 }
0x1758   :  { %v1034_v32 = vmul.f32 %v1032_v29, %v1027_v30 }
0x175a   :  { %1036 = vrot.lane.b32.xlu1 %v1034_v32, %s1279_s2 }
0x17cc   :  { %v1037_v33 = vpop.permute.xlu1 %1036 }
0x17cd   :  { %v1039_v34 = vadd.f32 %v1037_v33, %v1008_v54 }
0x17cf   :  { %1193 = vtanh.f32 %v1039_v34 }
0x17d5   :  { %v1194_v35 = vpop.eup %1193 }
0x17d6   :  { %v1041_v36 = vsub.f32 %v941_v21, %v1194_v35 }
0x17d8   :  { %1043 = vrot.lane.b32.xlu2 %v1041_v36, %s1280_s27 }
0x1832   :  { %v1044_v37 = vpop.permute.xlu2 %1043 }
0x1833   :  { %v1046_v47 = vmul.f32 %v1044_v37, %v1027_v30 }
0x1835   :  { %1048 = vrot.lane.b32.xlu0 %v1046_v47, %s1282_s28 }
0x18a7   :  { %v1049_v2 = vpop.permute.xlu0 %1048 }
0x18a8   :  { %v1051_v1 = vadd.f32 %v1194_v35, %v1049_v2 }
0x18aa   :  { %v1054_v3 = vrot.slane %v1051_v1, 2 }
0x18ac   :  { %1055 = vrot.lane.b32.xlu1 %v1054_v3, %s1279_s2 }
0x191e   :  { %v1056_v60 = vpop.permute.xlu1 %1055 }
0x191f   :  { %1128 = vmatmul.msk.f32.vlgmr.msra.gmra.mxu1 %vm157_vm8, %v1056_v60 }
0x199c   :  { %v1076_v6 = vpop.f32.mrf.mxu1 }
0x199d   :  { %v1077_v7 = vadd.f32 %v1140_v4, %v1076_v6 }
0x199f   :  { %1080 = vst.msk [vmem:[#allocation7] sm:$0x3] %vm1079_vm6, %v1077_v7 }
0x19a0   :  { %1091 = dma.vmem_to_hbm [thread:$0]  %s1087_s4, 32, %s1089_s7, [#allocation4]  }
0x19a1   :  { %1271 = dma.done.wait [#allocation4], 32  }
0x19a2   :  { %1272 = vsyncadd [#allocation4], 4294967264 }
0x19a3   :  { %1096 = vsyncpa [#allocation3], 1 }
0x19a4   :  { %1097 = vsyncpa [#allocation6], 1 }
0x19a5   :  { %1098 = vsyncpa [#allocation4], 1 }

</bundles_post_ra>
